<compile_context>
chip_gen: v7x
topology: tpu7x:2x2x1
jax: 0.10.0
libtpu: 0.0.40
codegen_flags: <defaults>
</compile_context>

<pallas_src>
import functools

import jax
import jax.numpy as jnp
from jax import lax
from jax.experimental import pallas as pl
from jax.experimental.pallas import tpu as pltpu


_TILE_CAP = 256  # one clean 256^2 MXU pass on v6e/v7x, 2 K-passes on v5e.


def _tiles(hw, cap=_TILE_CAP):
    """Tile size + padded HW. Small images: one full-extent tile (no pad).
    Larger: 256-wide lane-dense tiles, HW padded up to a 256 multiple."""
    if hw <= cap:
        return hw, hw
    hw_p = ((hw + cap - 1) // cap) * cap
    return cap, hw_p


def _warp_kernel(flag_ref, klo_ref, khi_ref,        # scalar prefetch (SMEM)
                 depth_ref, sx_ref, sy_ref,          # inputs (VMEM blocks)
                 out_ref,                            # output
                 acc_ref,                            # scratch
                 *, w, t):
    i = pl.program_id(0)      # sample
    o = pl.program_id(1)      # output tile
    flag = flag_ref[i]

    @pl.when(flag == 0)
    def _identity():
        # Zero shift -> grid_sample is an exact copy; skip the O(t^2) build.
        p0 = pl.multiple_of(o * t, t)
        out_ref[0, :, :] = depth_ref[0, :, pl.ds(p0, t)]

    @pl.when(flag != 0)
    def _warp():
        sx = sx_ref[0, :, :]                      # (1, t) clipped abs src x
        sy = sy_ref[0, :, :]                      # (1, t) clipped abs src y
        k_lo = klo_ref[i, o]                      # first source tile in band
        k_hi = khi_ref[i, o]                      # last  source tile in band

        acc_ref[...] = jnp.zeros_like(acc_ref)

        # Hoisted once per out-tile: column iota of in-tile positions.
        base = lax.broadcasted_iota(jnp.int32, (t, 1), 0).astype(jnp.float32)
        w_f = float(w)

        # Band-limited source loop: with ~0.5 px shifts this is 1-3 iterations
        # regardless of image size (vs HW/t for the dense loop).
        @pl.loop(0, k_hi - k_lo + 1)
        def _(step):
            kk = k_lo + step
            k0 = pl.multiple_of(kk * t, t)
            # Flat source index -> (row, col) via exact f32 floor-division
            # (exact for HW < 2^24); avoids int32 vector div/mod lowering.
            qf = base + (kk * t).astype(jnp.float32)          # (t, 1)
            qy = jnp.floor(qf / w_f)
            qx = qf - qy * w_f
            # Separable bilinear "tent" == the clamped 4-corner weights
            # exactly: nonzero only at the 2x2 neighbours of (sy, sx).
            # (bf16 build would be ~2x cheaper on v6e/v7x VPUs; kept f32 so
            # the same kernel is also optimal on v5e and bit-tight everywhere.)
            m = (jnp.maximum(0.0, 1.0 - jnp.abs(qx - sx)) *
                 jnp.maximum(0.0, 1.0 - jnp.abs(qy - sy)))     # (t, t)
            d = depth_ref[0, :, pl.ds(k0, t)].astype(jnp.float32)   # (c, t)
            acc_ref[...] += lax.dot_general(
                d, m, dimension_numbers=(((1,), (0,)), ((), ())),
                preferred_element_type=jnp.float32)

        out_ref[0, :, :] = acc_ref[...].astype(out_ref.dtype)


def _make_shifts(key, n, h, w, std=0.5, prob=0.8):
    """Glue: the module's torch.normal / torch.rand, done with jax.random."""
    k1, k2 = jax.random.split(key)
    shifts = std * jax.random.normal(k1, (n, h, w, 2), dtype=jnp.float32)
    apply_shifts = jax.random.uniform(k2, (n,)) < prob
    shifts = jnp.where(apply_shifts[:, None, None, None], shifts, 0.0)
    return shifts[..., 0], shifts[..., 1]


def depth_warping_pallas(depths, shift_x, shift_y):
    """Bilinear warp of depths (N,C,H,W) by per-pixel shifts, equivalent to
    F.grid_sample(mode='bilinear', padding_mode='border', align_corners=True)
    after the module's grid construction (its normalize and grid_sample's
    unnormalize cancel exactly for align_corners=True)."""
    n, c, h, w = depths.shape
    hw = h * w
    t, hw_p = _tiles(hw)
    n_out = hw_p // t

    shift_x = shift_x.reshape(n, hw).astype(jnp.float32)
    shift_y = shift_y.reshape(n, hw).astype(jnp.float32)

    # Absolute, border-clamped source coordinates (needed for the band bounds
    # anyway, so compute them once here instead of re-deriving in-kernel).
    xx = jnp.tile(jnp.arange(w, dtype=jnp.float32), h)          # (hw,) cols
    yy = jnp.repeat(jnp.arange(h, dtype=jnp.float32), w)        # (hw,) rows
    sx = jnp.clip(xx[None, :] + shift_x, 0.0, float(w - 1))     # (n, hw)
    sy = jnp.clip(yy[None, :] + shift_y, 0.0, float(h - 1))

    # Per-pixel flat source-index range (the 4 bilinear corners lie inside it).
    x0 = jnp.floor(sx)
    y0 = jnp.floor(sy)
    x1 = jnp.minimum(x0 + 1.0, float(w - 1))
    y1 = jnp.minimum(y0 + 1.0, float(h - 1))
    lo = (y0 * w + x0).astype(jnp.int32)                        # (n, hw)
    hi = (y1 * w + x1).astype(jnp.int32)

    # Per-sample identity flag (== the module's apply_shifts).
    flag = jnp.any((shift_x != 0.0) | (shift_y != 0.0), axis=-1).astype(jnp.int32)

    depths_flat = depths.reshape(n, c, hw)
    pad = hw_p - hw
    if pad:
        depths_flat = jnp.pad(depths_flat, ((0, 0), (0, 0), (0, pad)))
        sx = jnp.pad(sx, ((0, 0), (0, pad)))
        sy = jnp.pad(sy, ((0, 0), (0, pad)))
        lo = jnp.pad(lo, ((0, 0), (0, pad)))
        hi = jnp.pad(hi, ((0, 0), (0, pad)))

    # Per-(sample, out-tile) band of source tiles, scalar-prefetched to SMEM.
    k_lo = (jnp.min(lo.reshape(n, n_out, t), axis=-1) // t).astype(jnp.int32)
    k_hi = (jnp.max(hi.reshape(n, n_out, t), axis=-1) // t).astype(jnp.int32)

    sx = sx.reshape(n, 1, hw_p)
    sy = sy.reshape(n, 1, hw_p)

    kernel = functools.partial(_warp_kernel, w=w, t=t)

    out_flat = pl.pallas_call(
        kernel,
        out_shape=jax.ShapeDtypeStruct((n, c, hw_p), depths.dtype),
        grid_spec=pltpu.PrefetchScalarGridSpec(
            num_scalar_prefetch=3,
            grid=(n, n_out),
            in_specs=[
                # Full depth image stays resident per sample (block index only
                # changes with i); source tiles are sliced dynamically.
                pl.BlockSpec((1, c, hw_p), lambda i, o, f, kl, kh: (i, 0, 0)),
                pl.BlockSpec((1, 1, t), lambda i, o, f, kl, kh: (i, 0, o)),
                pl.BlockSpec((1, 1, t), lambda i, o, f, kl, kh: (i, 0, o)),
            ],
            out_specs=pl.BlockSpec((1, c, t), lambda i, o, f, kl, kh: (i, 0, o)),
            scratch_shapes=[pltpu.VMEM((c, t), jnp.float32)],
        ),
        compiler_params=pltpu.CompilerParams(
            # Both axes independent -> megacore / both v7x TCs even at small n.
            dimension_semantics=("parallel", "parallel"),
            vmem_limit_bytes=32 * 1024 * 1024,
        ),
        # TODO(synk): for very large images the resident (c, HW) depth block
        # should become a manual DMA-gather of just the banded source rows.
    )(flag, k_lo, k_hi, depths_flat, sx, sy)

    out = out_flat[..., :hw].reshape(n, c, h, w)
    # mimic torch `.squeeze(0).squeeze(0)` (no-op unless n==1 / c==1)
    if out.shape[0] == 1:
        out = out[0]
        if out.shape[0] == 1:
            out = out[0]
    return out


def _warp_reference(depths, shift_x, shift_y):
    """Pure-JAX reference of F.grid_sample(bilinear, border, align_corners)."""
    n, c, h, w = depths.shape
    xx = jnp.arange(w, dtype=jnp.float32)[None, None, :]
    yy = jnp.arange(h, dtype=jnp.float32)[None, :, None]
    sx = jnp.clip(xx + shift_x, 0.0, w - 1.0)
    sy = jnp.clip(yy + shift_y, 0.0, h - 1.0)
    x0f = jnp.floor(sx); y0f = jnp.floor(sy)
    wx = sx - x0f;       wy = sy - y0f
    x0 = x0f.astype(jnp.int32); y0 = y0f.astype(jnp.int32)
    x1 = jnp.minimum(x0 + 1, w - 1); y1 = jnp.minimum(y0 + 1, h - 1)

    bidx = jnp.arange(n)[:, None, None]

    def gather(yi, xi):
        g = depths[bidx, :, yi, xi]              # (n, h, w, c)
        return jnp.transpose(g, (0, 3, 1, 2))    # (n, c, h, w)

    wxe = wx[:, None, :, :]
    wye = wy[:, None, :, :]
    out = ((1.0 - wye) * ((1.0 - wxe) * gather(y0, x0) + wxe * gather(y0, x1))
           + wye * ((1.0 - wxe) * gather(y1, x0) + wxe * gather(y1, x1)))
    return out


if __name__ == "__main__":
    key = jax.random.PRNGKey(0)
    kd, ks = jax.random.split(key)

    n, c, h, w = 2, 4, 16, 16
    depths = jax.random.uniform(kd, (n, c, h, w), dtype=jnp.float32) * 10.0
    shift_x, shift_y = _make_shifts(ks, n, h, w, std=0.5, prob=0.8)

    out = depth_warping_pallas(depths, shift_x, shift_y)
    out = jax.block_until_ready(out)

    ref = _warp_reference(depths, shift_x, shift_y)
    assert out.shape == (n, c, h, w), out.shape
    if not bool(jnp.allclose(out, ref, atol=1e-3, rtol=1e-3)):
        raise AssertionError("Pallas kernel does not match JAX reference")

    print("KERNEL_OK")
</pallas_src>

<mosaic_0001>
module attributes {stable_mosaic.version = 11 : i64} {
  func.func @_warp_kernel(%arg0: i32, %arg1: i32, %arg2: memref<2xi32, #tpu.memory_space<smem>>, %arg3: memref<2x1xi32, #tpu.memory_space<smem>>, %arg4: memref<2x1xi32, #tpu.memory_space<smem>>, %arg5: memref<1x4x256xf32, #tpu.memory_space<vmem>>, %arg6: memref<1x1x256xf32, #tpu.memory_space<vmem>>, %arg7: memref<1x1x256xf32, #tpu.memory_space<vmem>>, %arg8: memref<1x4x256xf32, #tpu.memory_space<vmem>>, %arg9: memref<4x256xf32, #tpu.memory_space<vmem>>) attributes {dimension_semantics = [#tpu.dimension_semantics<parallel>, #tpu.dimension_semantics<parallel>], iteration_bounds = array<i64: 2, 1>, scalar_prefetch = 3 : i64, scratch_operands = 1 : i64, tpu.core_type = #tpu.core_type<tc>, window_params = [{transform_indices = @transform_0, window_bounds = array<i64: 1, 4, 256>}, {transform_indices = @transform_1, window_bounds = array<i64: 1, 1, 256>}, {transform_indices = @transform_2, window_bounds = array<i64: 1, 1, 256>}, {transform_indices = @transform_3, window_bounds = array<i64: 1, 4, 256>}]} {
    %0 = arith.index_cast %arg0 : i32 to index
    %1 = memref.load %arg2[%0] : memref<2xi32, #tpu.memory_space<smem>>
    %c0_i32 = arith.constant 0 : i32
    %2 = arith.cmpi eq, %1, %c0_i32 : i32
    %3 = arith.extui %2 : i1 to i32
    %c0_i32_0 = arith.constant 0 : i32
    %4 = arith.cmpi ne, %3, %c0_i32_0 : i32
    scf.if %4 {
      %c256_i32 = arith.constant 256 : i32
      %8 = arith.muli %arg1, %c256_i32 : i32
      %9 = tpu.assume_multiple %8, 256 : i32
      %c0 = arith.constant 0 : index
      %c0_3 = arith.constant 0 : index
      %10 = arith.index_cast %9 : i32 to index
      %11 = vector.load %arg5[%c0, %c0_3, %10] : memref<1x4x256xf32, #tpu.memory_space<vmem>>, vector<1x4x256xf32>
      %12 = vector.shape_cast %11 : vector<1x4x256xf32> to vector<4x256xf32>
      %c0_4 = arith.constant 0 : index
      %c0_5 = arith.constant 0 : index
      %c0_6 = arith.constant 0 : index
      %13 = vector.load %arg8[%c0_4, %c0_5, %c0_6] : memref<1x4x256xf32, #tpu.memory_space<vmem>>, vector<1x4x256xf32>
      %14 = vector.shape_cast %13 : vector<1x4x256xf32> to vector<4x256xf32>
      %15 = vector.shape_cast %12 : vector<4x256xf32> to vector<1x4x256xf32>
      tpu.vector_store %arg8[%c0_4, %c0_5, %c0_6], %15 {strides = array<i32>} : memref<1x4x256xf32, #tpu.memory_space<vmem>>, vector<1x4x256xf32>,
    } else {
    }
    %c0_i32_1 = arith.constant 0 : i32
    %5 = arith.cmpi ne, %1, %c0_i32_1 : i32
    %6 = arith.extui %5 : i1 to i32
    %c0_i32_2 = arith.constant 0 : i32
    %7 = arith.cmpi ne, %6, %c0_i32_2 : i32
    scf.if %7 {
      %c0 = arith.constant 0 : index
      %c0_3 = arith.constant 0 : index
      %c0_4 = arith.constant 0 : index
      %8 = vector.load %arg6[%c0, %c0_3, %c0_4] : memref<1x1x256xf32, #tpu.memory_space<vmem>>, vector<1x1x256xf32>
      %9 = vector.shape_cast %8 : vector<1x1x256xf32> to vector<1x256xf32>
      %c0_5 = arith.constant 0 : index
      %c0_6 = arith.constant 0 : index
      %c0_7 = arith.constant 0 : index
      %10 = vector.load %arg7[%c0_5, %c0_6, %c0_7] : memref<1x1x256xf32, #tpu.memory_space<vmem>>, vector<1x1x256xf32>
      %11 = vector.shape_cast %10 : vector<1x1x256xf32> to vector<1x256xf32>
      %12 = arith.index_cast %arg0 : i32 to index
      %13 = arith.index_cast %arg1 : i32 to index
      %14 = memref.load %arg3[%12, %13] : memref<2x1xi32, #tpu.memory_space<smem>>
      %15 = arith.index_cast %arg0 : i32 to index
      %16 = arith.index_cast %arg1 : i32 to index
      %17 = memref.load %arg4[%15, %16] : memref<2x1xi32, #tpu.memory_space<smem>>
      %cst = arith.constant 0.000000e+00 : f32
      %18 = vector.broadcast %cst : f32 to vector<4x256xf32>
      %c0_8 = arith.constant 0 : index
      %c0_9 = arith.constant 0 : index
      %19 = vector.load %arg9[%c0_8, %c0_9] : memref<4x256xf32, #tpu.memory_space<vmem>>, vector<4x256xf32>
      tpu.vector_store %arg9[%c0_8, %c0_9], %18 {strides = array<i32>} : memref<4x256xf32, #tpu.memory_space<vmem>>, vector<4x256xf32>,
      %20 = tpu.iota {dimensions = array<i32: 0>} : vector<256x1xi32>
      %21 = arith.sitofp %20 : vector<256x1xi32> to vector<256x1xf32>
      %22 = arith.subi %17, %14 : i32
      %c1_i32 = arith.constant 1 : i32
      %23 = arith.addi %22, %c1_i32 : i32
      %c0_i32_10 = arith.constant 0 : i32
      %24 = arith.subi %23, %c0_i32_10 : i32
      %c1_i32_11 = arith.constant 1 : i32
      %c1_i32_12 = arith.constant 1 : i32
      %25 = arith.subi %c1_i32_11, %c1_i32_12 : i32
      %26 = arith.addi %24, %25 : i32
      %c1_i32_13 = arith.constant 1 : i32
      %27 = arith.divsi %26, %c1_i32_13 : i32
      %c1_i32_14 = arith.constant 1 : i32
      %c0_i32_15 = arith.constant 0 : i32
      %c0_i32_16 = arith.constant 0 : i32
      %28 = arith.subi %27, %c0_i32_16 : i32
      %29 = arith.addi %c0_i32_16, %28 : i32
      %c1_i32_17 = arith.constant 1 : i32
      scf.for %arg10 = %c0_i32_16 to %29 step %c1_i32_17  : i32 {
        %34 = arith.muli %arg10, %c1_i32_14 : i32
        %35 = arith.addi %c0_i32_15, %34 : i32
        %36 = arith.addi %14, %35 : i32
        %c256_i32 = arith.constant 256 : i32
        %37 = arith.muli %36, %c256_i32 : i32
        %38 = tpu.assume_multiple %37, 256 : i32
        %c256_i32_23 = arith.constant 256 : i32
        %39 = arith.muli %36, %c256_i32_23 : i32
        %40 = arith.sitofp %39 : i32 to f32
        %41 = vector.broadcast %40 : f32 to vector<256x1xf32>
        %42 = arith.addf %21, %41 : vector<256x1xf32>
        %cst_24 = arith.constant 1.600000e+01 : f32
        %43 = vector.broadcast %cst_24 : f32 to vector<256x1xf32>
        %44 = arith.divf %42, %43 : vector<256x1xf32>
        %45 = math.floor %44 : vector<256x1xf32>
        %cst_25 = arith.constant 1.600000e+01 : f32
        %46 = vector.broadcast %cst_25 : f32 to vector<256x1xf32>
        %47 = arith.mulf %45, %46 : vector<256x1xf32>
        %48 = arith.subf %42, %47 : vector<256x1xf32>
        %49 = vector.broadcast %48 : vector<256x1xf32> to vector<256x256xf32>
        %50 = vector.broadcast %9 : vector<1x256xf32> to vector<256x256xf32>
        %51 = arith.subf %49, %50 : vector<256x256xf32>
        %52 = math.absf %51 : vector<256x256xf32>
        %cst_26 = arith.constant 1.000000e+00 : f32
        %53 = vector.broadcast %cst_26 : f32 to vector<256x256xf32>
        %54 = arith.subf %53, %52 : vector<256x256xf32>
        %cst_27 = arith.constant 0.000000e+00 : f32
        %55 = vector.broadcast %cst_27 : f32 to vector<256x256xf32>
        %56 = arith.maximumf %55, %54 : vector<256x256xf32>
        %57 = vector.broadcast %45 : vector<256x1xf32> to vector<256x256xf32>
        %58 = vector.broadcast %11 : vector<1x256xf32> to vector<256x256xf32>
        %59 = arith.subf %57, %58 : vector<256x256xf32>
        %60 = math.absf %59 : vector<256x256xf32>
        %cst_28 = arith.constant 1.000000e+00 : f32
        %61 = vector.broadcast %cst_28 : f32 to vector<256x256xf32>
        %62 = arith.subf %61, %60 : vector<256x256xf32>
        %cst_29 = arith.constant 0.000000e+00 : f32
        %63 = vector.broadcast %cst_29 : f32 to vector<256x256xf32>
        %64 = arith.maximumf %63, %62 : vector<256x256xf32>
        %65 = arith.mulf %56, %64 : vector<256x256xf32>
        %c0_30 = arith.constant 0 : index
        %c0_31 = arith.constant 0 : index
        %66 = arith.index_cast %38 : i32 to index
        %67 = vector.load %arg5[%c0_30, %c0_31, %66] : memref<1x4x256xf32, #tpu.memory_space<vmem>>, vector<1x4x256xf32>
        %68 = vector.shape_cast %67 : vector<1x4x256xf32> to vector<4x256xf32>
        %c0_32 = arith.constant 0 : index
        %c0_33 = arith.constant 0 : index
        %69 = vector.load %arg9[%c0_32, %c0_33] : memref<4x256xf32, #tpu.memory_space<vmem>>, vector<4x256xf32>
        %cst_34 = arith.constant dense<0.000000e+00> : vector<4x256xf32>
        %70 = tpu.matmul %68, %65, %cst_34 {dimension_numbers = #tpu.dot_dimension_numbers<[1], [0], [0], [1], [0, 0, 1, 1], [], []>} : vector<4x256xf32>, vector<256x256xf32>, vector<4x256xf32> -> vector<4x256xf32>
        %71 = arith.addf %69, %70 : vector<4x256xf32>
        %c0_35 = arith.constant 0 : index
        %c0_36 = arith.constant 0 : index
        %72 = vector.load %arg9[%c0_35, %c0_36] : memref<4x256xf32, #tpu.memory_space<vmem>>, vector<4x256xf32>
        tpu.vector_store %arg9[%c0_35, %c0_36], %71 {strides = array<i32>} : memref<4x256xf32, #tpu.memory_space<vmem>>, vector<4x256xf32>,
      }
      %c0_18 = arith.constant 0 : index
      %c0_19 = arith.constant 0 : index
      %30 = vector.load %arg9[%c0_18, %c0_19] : memref<4x256xf32, #tpu.memory_space<vmem>>, vector<4x256xf32>
      %c0_20 = arith.constant 0 : index
      %c0_21 = arith.constant 0 : index
      %c0_22 = arith.constant 0 : index
      %31 = vector.load %arg8[%c0_20, %c0_21, %c0_22] : memref<1x4x256xf32, #tpu.memory_space<vmem>>, vector<1x4x256xf32>
      %32 = vector.shape_cast %31 : vector<1x4x256xf32> to vector<4x256xf32>
      %33 = vector.shape_cast %30 : vector<4x256xf32> to vector<1x4x256xf32>
      tpu.vector_store %arg8[%c0_20, %c0_21, %c0_22], %33 {strides = array<i32>} : memref<1x4x256xf32, #tpu.memory_space<vmem>>, vector<1x4x256xf32>,
    } else {
    }
    return
  }
  func.func @transform_0(%arg0: i32, %arg1: i32, %arg2: memref<2xi32, #tpu.memory_space<smem>>, %arg3: memref<2x1xi32, #tpu.memory_space<smem>>, %arg4: memref<2x1xi32, #tpu.memory_space<smem>>) -> (i32, i32, i32) {
    %c0_i32 = arith.constant 0 : i32
    %c0_i32_0 = arith.constant 0 : i32
    %c0_i32_1 = arith.constant 0 : i32
    return %arg0, %c0_i32, %c0_i32_0 : i32, i32, i32
  }
  func.func @transform_1(%arg0: i32, %arg1: i32, %arg2: memref<2xi32, #tpu.memory_space<smem>>, %arg3: memref<2x1xi32, #tpu.memory_space<smem>>, %arg4: memref<2x1xi32, #tpu.memory_space<smem>>) -> (i32, i32, i32) {
    %c0_i32 = arith.constant 0 : i32
    %c0_i32_0 = arith.constant 0 : i32
    return %arg0, %c0_i32, %arg1 : i32, i32, i32
  }
  func.func @transform_2(%arg0: i32, %arg1: i32, %arg2: memref<2xi32, #tpu.memory_space<smem>>, %arg3: memref<2x1xi32, #tpu.memory_space<smem>>, %arg4: memref<2x1xi32, #tpu.memory_space<smem>>) -> (i32, i32, i32) {
    %c0_i32 = arith.constant 0 : i32
    %c0_i32_0 = arith.constant 0 : i32
    return %arg0, %c0_i32, %arg1 : i32, i32, i32
  }
  func.func @transform_3(%arg0: i32, %arg1: i32, %arg2: memref<2xi32, #tpu.memory_space<smem>>, %arg3: memref<2x1xi32, #tpu.memory_space<smem>>, %arg4: memref<2x1xi32, #tpu.memory_space<smem>>) -> (i32, i32, i32) {
    %c0_i32 = arith.constant 0 : i32
    %c0_i32_0 = arith.constant 0 : i32
    return %arg0, %c0_i32, %arg1 : i32, i32, i32
  }
}

</mosaic_0001>

<bundles_post_ra>
// kernel: tpu_custom_call.1
= control target key start
LH: loop header
LB: loop body
LE: loop exit
PB: predicated region body
PF: predicated region fallthrough
CT: control target
= control target key end

     0   :  { %s2280_s0 = inlined_call_operand.vmem [shape: s32[2], index: 0, kind: input, shape index: {}]   ;;  %s2281_s3 = inlined_call_operand.vmem [shape: f32[2,4,256], index: 3, kind: input, shape index: {}]   ;;  %s2282_s4 = inlined_call_operand.vmem [shape: f32[2,1,256], index: 4, kind: input, shape index: {}]   ;;  %s2283_s5 = inlined_call_operand.vmem [shape: f32[2,1,256], index: 5, kind: input, shape index: {}]   ;;  %s2284_s6 = inlined_call_operand.hbm [shape: f32[2,4,256], index: 6, kind: output, shape index: {}]   ;;  %s2285_s1 = inlined_call_operand.vmem [shape: s32[2,1], index: 1, kind: input, shape index: {}]   ;;  %s2286_s2 = inlined_call_operand.vmem [shape: s32[2,1], index: 2, kind: input, shape index: {}]  }
   0x1   :  { %s11_s23 = sshll.u32 %s2280_s0, 4  ;;  %s15_s26 = sshll.u32 %s2285_s1, 4  ;;  %s12_s23 = int_to_ptr.vmem [resolvable:$true] %s11_s23  ;;  %s16_s26 = int_to_ptr.vmem [resolvable:$true] %s15_s26 }
   0x2   :  { %s1500_s27 = scalar_lea.vmem %s12_s23, 16  ;;  %p1505_p1 = scmp.lt.s32.totalorder %s12_s23, %s12_s23 }
   0x3   :  { %p1501_p0 = scmp.ne.s32.totalorder %s12_s23, %s1500_s27  ;;  %p1506_p2 = scmp.lt.s32.totalorder %s1500_s27, %s1500_s27 }
   0x5   :  { %p1507_p3 = por %p1506_p2, %p1505_p1 }
   0x7   :  { %p1508_p4 = pnand %p1507_p3, %p1501_p0 }
   0x9   :  { %1511 = shalt.err (!%p1508_p4)  }
   0xa   :  { %s1626_s28 = smov [#allocation4]   ;;  %s1512_s29 = scalar_lea.vmem %s16_s26, 32 }
   0xb   :  { %14 = dma.vmem_to_smem %s12_s23, 16, %s1626_s28, [#allocation3] }
   0xc   :  { %p1513_p5 = scmp.ne.s32.totalorder %s16_s26, %s1512_s29  ;;  %p1517_p6 = scmp.lt.s32.totalorder %s16_s26, %s16_s26 }
   0xd   :  { %p1518_p7 = scmp.lt.s32.totalorder %s1512_s29, %s1512_s29 }
   0xf   :  { %p1519_p8 = por %p1518_p7, %p1517_p6 }
  0x11   :  { %p1520_p9 = pnand %p1519_p8, %p1513_p5 }
  0x13   :  { %1523 = shalt.err (!%p1520_p9)  }
  0x14   :  { %s1627_s0 = smov [#allocation5]   ;;  %s19_s7 = sshll.u32 %s2286_s2, 4  ;;  %s20_s7 = int_to_ptr.vmem [resolvable:$true] %s19_s7 }
  0x15   :  { %18 = dma.vmem_to_smem %s16_s26, 32, %s1627_s0, [#allocation3] }
  0x16   :  { %s1524_s8 = scalar_lea.vmem %s20_s7, 32  ;;  %p1529_p11 = scmp.lt.s32.totalorder %s20_s7, %s20_s7 }
  0x17   :  { %p1525_p10 = scmp.ne.s32.totalorder %s20_s7, %s1524_s8  ;;  %p1530_p12 = scmp.lt.s32.totalorder %s1524_s8, %s1524_s8 }
  0x19   :  { %p1531_p13 = por %p1530_p12, %p1529_p11 }
  0x1b   :  { %p1532_p0 = pnand %p1531_p13, %p1525_p10 }
  0x1d   :  { %1535 = shalt.err (!%p1532_p0)  }
  0x1e   :  { %s1628_s9 = smov [#allocation6]  }
  0x1f   :  { %22 = dma.vmem_to_smem %s20_s7, 32, %s1628_s9, [#allocation3] }
  0x20   :  { %1592 = dma.done.wait [#allocation3], 80 }
  0x21   :  { %1593 = vsyncadd [#allocation3], 4294967216 }
  0x22   :  { %24 = sfence }
  0x23   :  { %25 = vsyncpa [#allocation8], 0 }
  0x24   :  { %27 = vsyncpa [#allocation8 + $0x1], 0  ;;  %s1675_s10 = smov 0   ;;  %s1677_s11 = smov 0  }
  0x25   :  { %s1679_s2 = smov 0   ;;  %s1681_s12 = smov 0  }
  0x26   :  { %s1683_s13 = smov 0   ;;  %s1685_s14 = smov 0  }
  0x27 LB: > { %s1345_s15 = sadd.s32 4294967295, %s1620_s14   ;;  %s1346_s16 = sadd.s32 4294967294, %s1620_s14   ;;  %s1620_s14 = sphi %s1685_s14, %s33_s14   ;;  %s1616_s13 = sphi %s1683_s13, %s2380_s13   ;;  %s1612_s12 = sphi %s1681_s12, %s2379_s12   ;;  %s1608_s2 = sphi %s1679_s2, %s2378_s2   ;;  %s1604_s11 = sphi %s1677_s11, %s2377_s11   ;;  %s1600_s10 = sphi %s1675_s10, %s2376_s10  }
  0x28   : > { %s45_s17 = sadd.s32 1, %s1616_s13  ;;  %s136_s18 = sadd.s32 1, %s1608_s2 }
  0x29   : > { %p47_p1 = scmp.ge.s32.totalorder %s45_s17, 2  ;;  %p146_p2 = scmp.ne.s32.totalorder %s1608_s2, %s1604_s11 }
  0x2a   : > { %p147_p3 = scmp.eq.s32.totalorder %s1345_s15, 1  ;;  %p152_p4 = scmp.ne.s32.totalorder %s1604_s11, %s1600_s10 }
  0x2b   : > { %s2382_s17 = smov (%p47_p1, %s45_s17), 0  ;;  %p153_p6 = scmp.eq.s32.totalorder %s1346_s16, 1 }
  0x2c   : > { %p1715_p5 = por %p147_p3, %p146_p2  ;;  %s131_s20 = ssub.s32 %s1616_s13, %s2382_s17 }
  0x2d   : > { %p1349_p7 = scmp.ge.s32.totalorder %s1620_s14, 1  ;;  %p134_p8 = scmp.eq.s32.totalorder %s131_s20, 0 }
  0x2e   : > { %p1722_p9 = por %p153_p6, %p152_p4  ;;  %p203_p10 = scmp.lt.s32.totalorder %s1620_s14, 3 }
  0x2f   : > { %s1728_s22 = scalar_select %p134_p8, %s1608_s2, %s136_s18  }
  0x30   : > { %p204_p11 = pnand %p1349_p7, %p203_p10 }
  0x31   : > { %s240_s23 = sand.u32 (!%p204_p11), 1, %s1604_s11   ;;  %p243_p12 = scmp.lt.s32.totalorder (!%p204_p11), %s1612_s12, 1 }
  0x32   : > { %207 = sbr.rel (%p204_p11) target bundleno = 564 (0x234), region = 32  ;;  %s1350_s24 = sshll.u32 (!%p204_p11), %s240_s23, 3 }
  0x33   : > { %s267_s25 = sld [smem:[#allocation4 + %s1612_s12]] (!%p204_p11)  ;;  %s1747_s18 = scalar_lea.vmem (!%p204_p11), [#allocation7], %s1350_s24 }
  0x39   : > { %s244_s26 = scalar_select %p243_p12, %s1612_s12, 1 }
  0x3a   : > { %p1355_p13 = scmp.ne.s32.totalorder %s267_s25, 0 }
  0x3b   : > { %s1366_s27 = sshll.u32 %s244_s26, 3  ;;  %s1353_s28 = sshll.u32 %s244_s26, 1 }
  0x3c   : > { %s1739_s1 = scalar_lea.vmem %s2281_s3, %s1366_s27  ;;  %s255_s8 = scalar_lea.vmem %s2282_s4, %s1353_s28 }
  0x3d   : > { %s264_s16 = scalar_lea.vmem %s2283_s5, %s1353_s28  ;;  %271 = sbr.rel (%p1355_p13) target bundleno = 68 (0x44), region = 36  ;;  %v277_v0 = vld [vmem:[%s1739_s1] sm:$0xff] (!%p1355_p13) }
  0x3e   : > { %278 = vst [vmem:[%s1747_s18] sm:$0xff] (!%p1355_p13), %v277_v0 }
  0x44 PF: > { %p1356_p0 = scmp.eq.s32.totalorder %s267_s25, 0 }
  0x46   : > { %282 = sbr.rel (%p1356_p0) target bundleno = 540 (0x21c), region = 40 }
  0x4d   : > { %v1751_v1 = vld [vmem:[%s255_s8] sm:$0x3]  ;;  %s1357_s20 = sshll.u32 %s1612_s12, 7  ;;  %v295_v3 = vlaneseq  ;;  %v1629_v4 = vmov 0.0  }
  0x4e   : > { %2308 = vst [vmem:[#allocation11_spill] sm:$0xff] %v1751_v1  ;;  %v1753_v2 = vld [vmem:[%s264_s16] sm:$0x3]  ;;  %s1756_s26 = sld [smem:[#allocation5 + %s1357_s20]]  ;;  %294 = vst [vmem:[#allocation2] sm:$0xff] %v1629_v4 }
  0x4f   : > { %2309 = vst [vmem:[#allocation12_spill] sm:$0xff] %v1753_v2  ;;  %s293_s24 = sld [smem:[#allocation6 + %s1357_s20]]  ;;  %v1758_v5 = vshrl.u32 %v295_v3, 7 }
  0x51   : > { %2310 = vst [vmem:[#allocation13_spill] sm:$0xff] %v1758_v5  ;;  %v1761_v6 = vadd.s32 8, %v1758_v5  ;;  %v1764_v7 = vadd.s32 16, %v1758_v5  ;;  %v1767_v8 = vadd.s32 24, %v1758_v5  ;;  %v1770_v9 = vadd.s32 32, %v1758_v5 }
  0x52   : > { %v1773_v10 = vadd.s32 40, %v1758_v5  ;;  %v1776_v11 = vadd.s32 48, %v1758_v5  ;;  %v1779_v12 = vadd.s32 56, %v1758_v5  ;;  %v1782_v13 = vadd.s32 64, %v1758_v5 }
  0x53   : > { %2311 = vst [vmem:[#allocation14_spill] sm:$0xff] %v1761_v6  ;;  %2312 = vst [vmem:[#allocation15_spill] sm:$0xff] %v1764_v7  ;;  %v1785_v14 = vadd.s32 72, %v1758_v5  ;;  %v1788_v15 = vadd.s32 80, %v1758_v5  ;;  %v1791_v16 = vadd.s32 88, %v1758_v5  ;;  %v1794_v17 = vadd.s32 96, %v1758_v5 }
  0x54   : > { %2313 = vst [vmem:[#allocation16_spill] sm:$0xff] %v1767_v8  ;;  %2314 = vst [vmem:[#allocation17_spill] sm:$0xff] %v1770_v9  ;;  %v1797_v18 = vadd.s32 104, %v1758_v5  ;;  %v1800_v19 = vadd.s32 112, %v1758_v5  ;;  %v1803_v20 = vadd.s32 120, %v1758_v5  ;;  %v1806_v21 = vadd.s32 128, %v1758_v5 }
  0x55   : > { %2315 = vst [vmem:[#allocation18_spill] sm:$0xff] %v1773_v10  ;;  %2316 = vst [vmem:[#allocation19_spill] sm:$0xff] %v1776_v11  ;;  %s360_s25 = ssub.s32 %s293_s24, %s1756_s26  ;;  %v1810_v22 = vadd.s32 136, %v1758_v5  ;;  %v1813_v23 = vadd.s32 144, %v1758_v5  ;;  %v1816_v24 = vadd.s32 152, %v1758_v5  ;;  %v1819_v25 = vadd.s32 160, %v1758_v5 }
  0x56   : > { %2317 = vst [vmem:[#allocation20_spill] sm:$0xff] %v1779_v12  ;;  %s1821_s27 = sadd.s32 1, %s360_s25  ;;  %v1824_v26 = vadd.s32 168, %v1758_v5  ;;  %v1827_v27 = vadd.s32 176, %v1758_v5  ;;  %v1830_v28 = vadd.s32 184, %v1758_v5  ;;  %v1833_v29 = vadd.s32 192, %v1758_v5 }
  0x57   : > { %v1836_v30 = vadd.s32 200, %v1758_v5  ;;  %v1839_v31 = vadd.s32 208, %v1758_v5  ;;  %v1842_v32 = vadd.s32 216, %v1758_v5  ;;  %v1845_v33 = vadd.s32 224, %v1758_v5  ;;  %p1358_p1 = scmp.le.s32.totalorder %s1821_s27, 0 }
  0x58   : > { %2318 = vst [vmem:[#allocation21_spill] sm:$0xff] %v1833_v29  ;;  %v1848_v34 = vadd.s32 232, %v1758_v5  ;;  %v1851_v35 = vadd.s32 240, %v1758_v5  ;;  %v1854_v36 = vadd.s32 248, %v1758_v5  ;;  %s1889_s28 = smov (!%p1358_p1), 0  }
  0x59   : > { %2319 = vst [vmem:[#allocation22_spill] sm:$0xff] %v1836_v30  ;;  %2320 = vst [vmem:[#allocation23_spill] sm:$0xff] %v1839_v31  ;;  %1301 = sbr.rel (%p1358_p1) target bundleno = 532 (0x214), region = 84 }
  0x5a   : > { %2321 = vst [vmem:[#allocation24_spill] sm:$0xff] %v1842_v32  ;;  %2322 = vst [vmem:[#allocation25_spill] sm:$0xff] %v1845_v33 }
  0x5b   : > { %2323 = vst [vmem:[#allocation26_spill] sm:$0xff] %v1848_v34  ;;  %2324 = vst [vmem:[#allocation27_spill] sm:$0xff] %v1851_v35 }
  0x5c   : > { %2325 = vst [vmem:[#allocation28_spill] sm:$0xff] %v1854_v36 }
  0x60 LB: >> { %v2326_v5 = vld [vmem:[#allocation13_spill] sm:$0xff]  ;;  %v2327_v2 = vld [vmem:[#allocation12_spill] sm:$0xff]  ;;  %v2328_v1 = vld [vmem:[#allocation11_spill] sm:$0xff]  ;;  %s368_s29 = sadd.s32 %s1624_s28, %s1756_s26  ;;  %s365_s28 = sadd.s32 1, %s1624_s28   ;;  %s1624_s28 = sphi %s1889_s28, %s365_s28  }
  0x61   : >> { %v540_v3 = vsub.s32 1, %v2326_v5  ;;  %v536_v4 = vsub.s32 0, %v2326_v5  ;;  %s1898_s0 = sshll.u32 %s368_s29, 8  ;;  %v2329_v37 = vcvt.s32.f32 %v2326_v5  ;;  %v2330_v6 = vld [vmem:[#allocation14_spill] sm:$0xff]  ;;  %v2332_v7 = vld [vmem:[#allocation15_spill] sm:$0xff]  ;;  %v2334_v8 = vld [vmem:[#allocation16_spill] sm:$0xff]  ;;  %p364_p2 = scmp.ge.s32.totalorder %s365_s28, %s1821_s27 }
  0x62   : >> { %s370_s30 = scvt.s32.f32 %s1898_s0  ;;  %v2331_v38 = vcvt.s32.f32 %v2330_v6  ;;  %v2333_v39 = vcvt.s32.f32 %v2332_v7  ;;  %v2335_v40 = vcvt.s32.f32 %v2334_v8  ;;  %v2336_v9 = vld [vmem:[#allocation17_spill] sm:$0xff]  ;;  %v2338_v10 = vld [vmem:[#allocation18_spill] sm:$0xff]  ;;  %v2340_v11 = vld [vmem:[#allocation19_spill] sm:$0xff]  ;;  %s1131_s7 = sshra.s32 %s1898_s0, 7 }
  0x63   : >> { %v1902_v58 = vrot.slane %v2328_v1, %v540_v3  ;;  %v1907_v0 = vrot.slane %v2327_v2, %v540_v3  ;;  %v1910_v63 = vrot.slane %v2328_v1, %v536_v4  ;;  %v1913_v62 = vrot.slane %v2327_v2, %v536_v4  ;;  %v2342_v12 = vld [vmem:[#allocation20_spill] sm:$0xff]  ;;  %s1360_s8 = sshll.u32 %s1131_s7, 2 }
  0x64   : >> { %v1904_v57 = vstv %s370_s30  ;;  %v2337_v41 = vcvt.s32.f32 %v2336_v9  ;;  %v2339_v42 = vcvt.s32.f32 %v2338_v10  ;;  %v2341_v43 = vcvt.s32.f32 %v2340_v11  ;;  %s1134_s9 = scalar_lea.vmem %s1739_s1, %s1360_s8 }
  0x65   : >> { %v372_v61 = vadd.f32 %v1904_v57, %v2329_v37  ;;  %v373_v60 = vadd.f32 %v1904_v57, %v2331_v38  ;;  %v374_v59 = vadd.f32 %v1904_v57, %v2333_v39  ;;  %v375_v3 = vadd.f32 %v1904_v57, %v2335_v40 }
  0x66   : >> { %v1930_v4 = vadd.f32 %v1904_v57, %v2337_v41  ;;  %v1935_v37 = vadd.f32 %v1904_v57, %v2339_v42  ;;  %v1940_v38 = vadd.f32 %v1904_v57, %v2341_v43  ;;  %v2343_v44 = vcvt.s32.f32 %v2342_v12 }
  0x67   : >> { %v405_v40 = vmul.f32 0.0625, %v372_v61  ;;  %v406_v56 = vmul.f32 0.0625, %v373_v60  ;;  %v407_v55 = vmul.f32 0.0625, %v374_v59  ;;  %v408_v41 = vmul.f32 0.0625, %v375_v3 }
  0x68   : >> { %v1945_v39 = vadd.f32 %v1904_v57, %v2343_v44  ;;  %v409_v54 = vmul.f32 0.0625, %v1930_v4  ;;  %v410_v53 = vmul.f32 0.0625, %v1935_v37  ;;  %v411_v42 = vmul.f32 0.0625, %v1940_v38 }
  0x69   : >> { %v437_v51 = vfloor.f32 %v405_v40  ;;  %v438_v43 = vfloor.f32 %v406_v56  ;;  %v1951_v50 = vfloor.f32 %v407_v55  ;;  %v1953_v49 = vfloor.f32 %v408_v41 }
  0x6a   : >> { %v412_v52 = vmul.f32 0.0625, %v1945_v39  ;;  %v1955_v44 = vfloor.f32 %v409_v54  ;;  %v1957_v48 = vfloor.f32 %v410_v53  ;;  %v1959_v47 = vfloor.f32 %v411_v42 }
  0x6b   : >> { %v469_v45 = vmul.f32 16.0, %v437_v51  ;;  %v470_v1 = vmul.f32 16.0, %v438_v43  ;;  %v812_v2 = vsub.f32 %v437_v51, %v1907_v0  ;;  %v814_v5 = vsub.f32 %v438_v43, %v1907_v0 }
  0x6c   : >> { %v1961_v46 = vfloor.f32 %v412_v52  ;;  %v811_v40 = vsub.f32 %v437_v51, %v1913_v62  ;;  %v813_v55 = vsub.f32 %v438_v43, %v1913_v62  ;;  %v471_v41 = vmul.f32 16.0, %v1951_v50 }
  0x6d   : >> { %v472_v54 = vmul.f32 16.0, %v1953_v49  ;;  %v501_v53 = vsub.f32 %v372_v61, %v469_v45  ;;  %v502_v56 = vsub.f32 %v373_v60, %v470_v1  ;;  %v876_v42 = vand.u32 2147483647, %v812_v2 }
  0x6e   : >> { %v878_v6 = vand.u32 2147483647, %v814_v5  ;;  %v875_v52 = vand.u32 2147483647, %v811_v40  ;;  %v877_v7 = vand.u32 2147483647, %v813_v55  ;;  %v503_v8 = vsub.f32 %v374_v59, %v471_v41 }
  0x6f   : >> { %v504_v9 = vsub.f32 %v375_v3, %v472_v54  ;;  %v545_v10 = vsub.f32 %v501_v53, %v1902_v58  ;;  %v547_v11 = vsub.f32 %v502_v56, %v1902_v58  ;;  %v940_v12 = vsub.f32 1.0, %v876_v42 }
  0x70   : >> { %v942_v51 = vsub.f32 1.0, %v878_v6  ;;  %v544_v43 = vsub.f32 %v501_v53, %v1910_v63  ;;  %v546_v36 = vsub.f32 %v502_v56, %v1910_v63  ;;  %v939_v35 = vsub.f32 1.0, %v875_v52 }
  0x71   : >> { %v941_v34 = vsub.f32 1.0, %v877_v7  ;;  %v609_v45 = vand.u32 2147483647, %v545_v10  ;;  %v611_v1 = vand.u32 2147483647, %v547_v11  ;;  %v1004_v2 = vmax.f32 %v940_v12, 0.0 }
  0x72   : >> { %v1006_v5 = vmax.f32 %v942_v51, 0.0  ;;  %v608_v60 = vand.u32 2147483647, %v544_v43  ;;  %v610_v61 = vand.u32 2147483647, %v546_v36  ;;  %v1003_v59 = vmax.f32 %v939_v35, 0.0 }
  0x73   : >> { %v1005_v3 = vmax.f32 %v941_v34, 0.0  ;;  %v673_v40 = vsub.f32 1.0, %v609_v45  ;;  %v675_v55 = vsub.f32 1.0, %v611_v1  ;;  %v549_v41 = vsub.f32 %v503_v8, %v1902_v58 }
  0x74   : >> { %v551_v6 = vsub.f32 %v504_v9, %v1902_v58  ;;  %v672_v54 = vsub.f32 1.0, %v608_v60  ;;  %v674_v53 = vsub.f32 1.0, %v610_v61  ;;  %v816_v56 = vsub.f32 %v1951_v50, %v1907_v0 }
  0x75   : >> { %v818_v7 = vsub.f32 %v1953_v49, %v1907_v0  ;;  %v737_v10 = vmax.f32 %v673_v40, 0.0  ;;  %v739_v11 = vmax.f32 %v675_v55, 0.0  ;;  %v613_v12 = vand.u32 2147483647, %v549_v41 }
  0x76   : >> { %v615_v36 = vand.u32 2147483647, %v551_v6  ;;  %v736_v35 = vmax.f32 %v672_v54, 0.0  ;;  %v738_v34 = vmax.f32 %v674_v53, 0.0  ;;  %v880_v42 = vand.u32 2147483647, %v816_v56 }
  0x77   : >> { %v882_v52 = vand.u32 2147483647, %v818_v7  ;;  %v1068_v51 = vmul.f32 %v1004_v2, %v737_v10  ;;  %v1070_v43 = vmul.f32 %v1006_v5, %v739_v11  ;;  %v677_v45 = vsub.f32 1.0, %v613_v12 }
  0x78   : >> { %v679_v1 = vsub.f32 1.0, %v615_v36  ;;  %v1067_v60 = vmul.f32 %v1003_v59, %v736_v35  ;;  %v1069_v61 = vmul.f32 %v1005_v3, %v738_v34  ;;  %v944_v33 = vsub.f32 1.0, %v880_v42 }
  0x79   : >> { %v946_v32 = vsub.f32 1.0, %v882_v52  ;;  %v1368_v31 = vpack.c.bf16 %v1070_v43, %v1068_v51  ;;  %v741_v30 = vmax.f32 %v677_v45, 0.0  ;;  %v548_v40 = vsub.f32 %v503_v8, %v1910_v63 }
  0x7a   : >> { %v743_v29 = vmax.f32 %v679_v1, 0.0  ;;  %v1370_v55 = vpack.c.bf16 %v1069_v61, %v1067_v60  ;;  %v1008_v41 = vmax.f32 %v944_v33, 0.0  ;;  %v550_v54 = vsub.f32 %v504_v9, %v1910_v63 }
  0x7b   : >> { %v1010_v6 = vmax.f32 %v946_v32, 0.0  ;;  %1369 = vmatprep.subr.bf16.mxu0 %v1368_v31  ;;  %v612_v53 = vand.u32 2147483647, %v548_v40  ;;  %v815_v2 = vsub.f32 %v1951_v50, %v1913_v62  ;;  %v817_v5 = vsub.f32 %v1953_v49, %v1913_v62 }
  0x7c   : >> { %v473_v59 = vmul.f32 16.0, %v1955_v44  ;;  %1371 = vmatpush1.bf16.msra.mxu0 %v1370_v55  ;;  %v1072_v3 = vmul.f32 %v1008_v41, %v741_v30  ;;  %v614_v7 = vand.u32 2147483647, %v550_v54  ;;  %v474_v8 = vmul.f32 16.0, %v1957_v48 }
  0x7d   : >> { %v1074_v56 = vmul.f32 %v1010_v6, %v743_v29  ;;  %v676_v33 = vsub.f32 1.0, %v612_v53  ;;  %v879_v32 = vand.u32 2147483647, %v815_v2  ;;  %v881_v10 = vand.u32 2147483647, %v817_v5 }
  0x7e   : >> { %v505_v9 = vsub.f32 %v1930_v4, %v473_v59  ;;  %v678_v11 = vsub.f32 1.0, %v614_v7  ;;  %v506_v50 = vsub.f32 %v1935_v37, %v474_v8  ;;  %v820_v49 = vsub.f32 %v1955_v44, %v1907_v0 }
  0x7f   : >> { %v1372_v31 = vpack.c.bf16 %v1074_v56, %v1072_v3  ;;  %v740_v12 = vmax.f32 %v676_v33, 0.0  ;;  %v943_v36 = vsub.f32 1.0, %v879_v32  ;;  %v945_v35 = vsub.f32 1.0, %v881_v10 }
  0x80   : >> { %v553_v29 = vsub.f32 %v505_v9, %v1902_v58  ;;  %v742_v30 = vmax.f32 %v678_v11, 0.0  ;;  %v555_v34 = vsub.f32 %v506_v50, %v1902_v58  ;;  %v822_v42 = vsub.f32 %v1957_v48, %v1907_v0 }
  0x81   : >> { %1373 = vmatprep.subr.bf16.mxu0 %v1372_v31  ;;  %v884_v4 = vand.u32 2147483647, %v820_v49  ;;  %v1007_v52 = vmax.f32 %v943_v36, 0.0  ;;  %v1009_v51 = vmax.f32 %v945_v35, 0.0  ;;  %v552_v37 = vsub.f32 %v505_v9, %v1910_v63 }
  0x82   : >> { %v617_v43 = vand.u32 2147483647, %v553_v29  ;;  %v619_v45 = vand.u32 2147483647, %v555_v34  ;;  %v886_v1 = vand.u32 2147483647, %v822_v42  ;;  %v554_v61 = vsub.f32 %v506_v50, %v1910_v63 }
  0x83   : >> { %v948_v60 = vsub.f32 1.0, %v884_v4  ;;  %v1071_v40 = vmul.f32 %v1007_v52, %v740_v12  ;;  %v1073_v55 = vmul.f32 %v1009_v51, %v742_v30  ;;  %v616_v6 = vand.u32 2147483647, %v552_v37 }
  0x84   : >> { %v681_v41 = vsub.f32 1.0, %v617_v43  ;;  %v683_v54 = vsub.f32 1.0, %v619_v45  ;;  %v950_v53 = vsub.f32 1.0, %v886_v1  ;;  %v618_v5 = vand.u32 2147483647, %v554_v61 }
  0x85   : >> { %v1012_v2 = vmax.f32 %v948_v60, 0.0  ;;  %v1374_v59 = vpack.c.bf16 %v1073_v55, %v1071_v40  ;;  %v680_v56 = vsub.f32 1.0, %v616_v6  ;;  %v819_v7 = vsub.f32 %v1955_v44, %v1913_v62 }
  0x86   : >> { %v745_v3 = vmax.f32 %v681_v41, 0.0  ;;  %v747_v8 = vmax.f32 %v683_v54, 0.0  ;;  %v1014_v33 = vmax.f32 %v950_v53, 0.0  ;;  %v682_v32 = vsub.f32 1.0, %v618_v5 }
  0x87   : >> { %v821_v10 = vsub.f32 %v1957_v48, %v1913_v62  ;;  %1375 = vmatpush1.bf16.msra.mxu0 %v1374_v59  ;;  %v744_v31 = vmax.f32 %v680_v56, 0.0  ;;  %v883_v11 = vand.u32 2147483647, %v819_v7  ;;  %v475_v50 = vmul.f32 16.0, %v1959_v47 }
  0x88   : >> { %v1076_v9 = vmul.f32 %v1012_v2, %v745_v3  ;;  %v1078_v49 = vmul.f32 %v1014_v33, %v747_v8  ;;  %v746_v12 = vmax.f32 %v682_v32, 0.0  ;;  %v476_v35 = vmul.f32 16.0, %v1961_v46 }
  0x89   : >> { %v885_v36 = vand.u32 2147483647, %v821_v10  ;;  %v947_v29 = vsub.f32 1.0, %v883_v11  ;;  %v507_v44 = vsub.f32 %v1940_v38, %v475_v50  ;;  %v824_v30 = vsub.f32 %v1959_v47, %v1907_v0 }
  0x8a   : >> { %v826_v48 = vsub.f32 %v1961_v46, %v1907_v0  ;;  %v1376_v34 = vpack.c.bf16 %v1078_v49, %v1076_v9  ;;  %v508_v4 = vsub.f32 %v1945_v39, %v476_v35  ;;  %v823_v52 = vsub.f32 %v1959_v47, %v1913_v62 }
  0x8b   : >> { %v949_v42 = vsub.f32 1.0, %v885_v36  ;;  %v1011_v51 = vmax.f32 %v947_v29, 0.0  ;;  %v557_v43 = vsub.f32 %v507_v44, %v1902_v58  ;;  %v888_v37 = vand.u32 2147483647, %v824_v30 }
  0x8c   : >> { %v890_v45 = vand.u32 2147483647, %v826_v48  ;;  %1377 = vmatprep.subr.bf16.mxu0 %v1376_v34  ;;  %v559_v1 = vsub.f32 %v508_v4, %v1902_v58  ;;  %v556_v60 = vsub.f32 %v507_v44, %v1910_v63  ;;  %v558_v61 = vsub.f32 %v508_v4, %v1910_v63 }
  0x8d   : >> { %v1013_v38 = vmax.f32 %v949_v42, 0.0  ;;  %v1075_v40 = vmul.f32 %v1011_v51, %v744_v31  ;;  %v621_v55 = vand.u32 2147483647, %v557_v43  ;;  %v952_v41 = vsub.f32 1.0, %v888_v37 }
  0x8e   : >> { %v954_v39 = vsub.f32 1.0, %v890_v45  ;;  %v623_v54 = vand.u32 2147483647, %v559_v1  ;;  %v620_v47 = vand.u32 2147483647, %v556_v60  ;;  %v825_v3 = vsub.f32 %v1961_v46, %v1913_v62 }
  0x8f   : >> { %v1077_v6 = vmul.f32 %v1013_v38, %v746_v12  ;;  %v622_v53 = vand.u32 2147483647, %v558_v61  ;;  %v685_v2 = vsub.f32 1.0, %v621_v55  ;;  %v1016_v5 = vmax.f32 %v952_v41, 0.0 }
  0x90   : >> { %v1018_v59 = vmax.f32 %v954_v39, 0.0  ;;  %v687_v7 = vsub.f32 1.0, %v623_v54  ;;  %v684_v8 = vsub.f32 1.0, %v620_v47  ;;  %v887_v10 = vand.u32 2147483647, %v823_v52 }
  0x91   : >> { %v1378_v56 = vpack.c.bf16 %v1077_v6, %v1075_v40  ;;  %v686_v33 = vsub.f32 1.0, %v622_v53  ;;  %v749_v32 = vmax.f32 %v685_v2, 0.0  ;;  %v889_v9 = vand.u32 2147483647, %v825_v3 }
  0x92   : >> { %v2344_v31 = vcvt.s32.f32 %v1782_v13  ;;  %v751_v50 = vmax.f32 %v687_v7, 0.0  ;;  %v748_v49 = vmax.f32 %v684_v8, 0.0  ;;  %v2345_v36 = vcvt.s32.f32 %v1785_v14 }
  0x93   : >> { %1379 = vmatpush1.bf16.msra.mxu0 %v1378_v56  ;;  %v750_v12 = vmax.f32 %v686_v33, 0.0  ;;  %v1080_v46 = vmul.f32 %v1016_v5, %v749_v32  ;;  %v951_v29 = vsub.f32 1.0, %v887_v10  ;;  %v953_v44 = vsub.f32 1.0, %v889_v9 }
  0x94   : >> { %v380_v11 = vadd.f32 %v1904_v57, %v2344_v31  ;;  %v381_v35 = vadd.f32 %v1904_v57, %v2345_v36  ;;  %v1082_v48 = vmul.f32 %v1018_v59, %v751_v50  ;;  %v2346_v42 = vcvt.s32.f32 %v1788_v15 }
  0x95   : >> { %v2347_v52 = vcvt.s32.f32 %v1791_v16  ;;  %v1015_v43 = vmax.f32 %v951_v29, 0.0  ;;  %v1017_v37 = vmax.f32 %v953_v44, 0.0  ;;  %v2348_v38 = vcvt.s32.f32 %v1794_v17 }
  0x96   : >> { %v413_v30 = vmul.f32 0.0625, %v380_v11  ;;  %v414_v34 = vmul.f32 0.0625, %v381_v35  ;;  %v382_v4 = vadd.f32 %v1904_v57, %v2346_v42  ;;  %v1380_v60 = vpack.c.bf16 %v1082_v48, %v1080_v46 }
  0x97   : >> { %v383_v51 = vadd.f32 %v1904_v57, %v2347_v52  ;;  %v2032_v1 = vadd.f32 %v1904_v57, %v2348_v38  ;;  %v1079_v41 = vmul.f32 %v1015_v43, %v748_v49  ;;  %v1081_v39 = vmul.f32 %v1017_v37, %v750_v12 }
  0x98   : >> { %v445_v45 = vfloor.f32 %v413_v30  ;;  %v446_v61 = vfloor.f32 %v414_v34  ;;  %v415_v40 = vmul.f32 0.0625, %v382_v4  ;;  %1381 = vmatprep.subr.bf16.mxu0 %v1380_v60 }
  0x99   : >> { %v416_v55 = vmul.f32 0.0625, %v383_v51  ;;  %v1382_v59 = vpack.c.bf16 %v1081_v39, %v1079_v41 }
  0x9a   : >> { %v477_v6 = vmul.f32 16.0, %v445_v45  ;;  %v828_v54 = vsub.f32 %v445_v45, %v1907_v0  ;;  %v478_v47 = vmul.f32 16.0, %v446_v61  ;;  %v830_v53 = vsub.f32 %v446_v61, %v1907_v0 }
  0x9b   : >> { %v827_v2 = vsub.f32 %v445_v45, %v1913_v62  ;;  %v829_v5 = vsub.f32 %v446_v61, %v1913_v62  ;;  %v2038_v7 = vfloor.f32 %v415_v40  ;;  %1383 = vmatpush1.bf16.msra.mxu0 %v1382_v59  ;;  %v448_v49 = vfloor.f32 %v416_v55 }
  0x9c   : >> { %v509_v3 = vsub.f32 %v380_v11, %v477_v6  ;;  %v892_v56 = vand.u32 2147483647, %v828_v54  ;;  %v510_v8 = vsub.f32 %v381_v35, %v478_v47  ;;  %v894_v33 = vand.u32 2147483647, %v830_v53 }
  0x9d   : >> { %v891_v32 = vand.u32 2147483647, %v827_v2  ;;  %v893_v10 = vand.u32 2147483647, %v829_v5  ;;  %v479_v38 = vmul.f32 16.0, %v2038_v7  ;;  %v480_v40 = vmul.f32 16.0, %v448_v49 }
  0x9e   : >> { %v561_v9 = vsub.f32 %v509_v3, %v1902_v58  ;;  %v956_v31 = vsub.f32 1.0, %v892_v56  ;;  %v560_v50 = vsub.f32 %v509_v3, %v1910_v63  ;;  %v563_v12 = vsub.f32 %v510_v8, %v1902_v58 }
  0x9f   : >> { %v958_v36 = vsub.f32 1.0, %v894_v33  ;;  %v562_v46 = vsub.f32 %v510_v8, %v1910_v63  ;;  %v955_v11 = vsub.f32 1.0, %v891_v32  ;;  %v957_v35 = vsub.f32 1.0, %v893_v10 }
  0xa0   : >> { %v625_v29 = vand.u32 2147483647, %v561_v9  ;;  %v1020_v44 = vmax.f32 %v956_v31, 0.0  ;;  %v624_v30 = vand.u32 2147483647, %v560_v50  ;;  %v832_v55 = vsub.f32 %v2038_v7, %v1907_v0 }
  0xa1   : >> { %v627_v48 = vand.u32 2147483647, %v563_v12  ;;  %v1022_v34 = vmax.f32 %v958_v36, 0.0  ;;  %v626_v42 = vand.u32 2147483647, %v562_v46  ;;  %v1019_v52 = vmax.f32 %v955_v11, 0.0 }
  0xa2   : >> { %v689_v43 = vsub.f32 1.0, %v625_v29  ;;  %v688_v37 = vsub.f32 1.0, %v624_v30  ;;  %v1021_v45 = vmax.f32 %v957_v35, 0.0  ;;  %v511_v6 = vsub.f32 %v382_v4, %v479_v38 }
  0xa3   : >> { %v691_v60 = vsub.f32 1.0, %v627_v48  ;;  %v690_v61 = vsub.f32 1.0, %v626_v42  ;;  %v834_v54 = vsub.f32 %v448_v49, %v1907_v0  ;;  %v512_v2 = vsub.f32 %v383_v51, %v480_v40 }
  0xa4   : >> { %v753_v41 = vmax.f32 %v689_v43, 0.0  ;;  %v752_v39 = vmax.f32 %v688_v37, 0.0  ;;  %v896_v5 = vand.u32 2147483647, %v832_v55  ;;  %v565_v56 = vsub.f32 %v511_v6, %v1902_v58 }
  0xa5   : >> { %v755_v47 = vmax.f32 %v691_v60, 0.0  ;;  %v754_v53 = vmax.f32 %v690_v61, 0.0  ;;  %v898_v8 = vand.u32 2147483647, %v834_v54  ;;  %v567_v10 = vsub.f32 %v512_v2, %v1902_v58 }
  0xa6   : >> { %v1084_v59 = vmul.f32 %v1020_v44, %v753_v41  ;;  %v1083_v3 = vmul.f32 %v1019_v52, %v752_v39  ;;  %v960_v9 = vsub.f32 1.0, %v896_v5  ;;  %v629_v31 = vand.u32 2147483647, %v565_v56 }
  0xa7   : >> { %v1086_v33 = vmul.f32 %v1022_v34, %v755_v47  ;;  %v1085_v32 = vmul.f32 %v1021_v45, %v754_v53  ;;  %v962_v50 = vsub.f32 1.0, %v898_v8  ;;  %v564_v4 = vsub.f32 %v511_v6, %v1910_v63 }
  0xa8   : >> { %v566_v12 = vsub.f32 %v512_v2, %v1910_v63  ;;  %v631_v51 = vand.u32 2147483647, %v567_v10  ;;  %v1024_v11 = vmax.f32 %v960_v9, 0.0  ;;  %v693_v29 = vsub.f32 1.0, %v629_v31 }
  0xa9   : >> { %v1384_v36 = vpack.c.bf16 %v1086_v33, %v1084_v59  ;;  %v1386_v46 = vpack.c.bf16 %v1085_v32, %v1083_v3  ;;  %v1026_v44 = vmax.f32 %v962_v50, 0.0  ;;  %v628_v30 = vand.u32 2147483647, %v564_v4 }
  0xaa   : >> { %v630_v35 = vand.u32 2147483647, %v566_v12  ;;  %v695_v48 = vsub.f32 1.0, %v631_v51  ;;  %v831_v34 = vsub.f32 %v2038_v7, %v1913_v62  ;;  %v833_v42 = vsub.f32 %v448_v49, %v1913_v62 }
  0xab   : >> { %1385 = vmatprep.subr.bf16.mxu0 %v1384_v36  ;;  %v2349_v52 = vcvt.s32.f32 %v1797_v18  ;;  %v757_v37 = vmax.f32 %v693_v29, 0.0  ;;  %v692_v45 = vsub.f32 1.0, %v628_v30  ;;  %v417_v60 = vmul.f32 0.0625, %v2032_v1 }
  0xac   : >> { %1387 = vmatpush1.bf16.msra.mxu0 %v1386_v46  ;;  %v694_v38 = vsub.f32 1.0, %v630_v35  ;;  %v759_v61 = vmax.f32 %v695_v48, 0.0  ;;  %v895_v40 = vand.u32 2147483647, %v831_v34  ;;  %v897_v55 = vand.u32 2147483647, %v833_v42 }
  0xad   : >> { %v385_v43 = vadd.f32 %v1904_v57, %v2349_v52  ;;  %v1088_v39 = vmul.f32 %v1024_v11, %v757_v37  ;;  %v756_v6 = vmax.f32 %v692_v45, 0.0  ;;  %v449_v7 = vfloor.f32 %v417_v60 }
  0xae   : >> { %v758_v54 = vmax.f32 %v694_v38, 0.0  ;;  %v1090_v47 = vmul.f32 %v1026_v44, %v759_v61  ;;  %v959_v49 = vsub.f32 1.0, %v895_v40  ;;  %v961_v53 = vsub.f32 1.0, %v897_v55 }
  0xaf   : >> { %v418_v41 = vmul.f32 0.0625, %v385_v43  ;;  %v481_v5 = vmul.f32 16.0, %v449_v7  ;;  %v836_v59 = vsub.f32 %v449_v7, %v1907_v0  ;;  %v835_v3 = vsub.f32 %v449_v7, %v1913_v62 }
  0xb0   : >> { %v2350_v56 = vcvt.s32.f32 %v1800_v19  ;;  %v1388_v33 = vpack.c.bf16 %v1090_v47, %v1088_v39  ;;  %v1023_v32 = vmax.f32 %v959_v49, 0.0  ;;  %v1025_v10 = vmax.f32 %v961_v53, 0.0 }
  0xb1   : >> { %v450_v2 = vfloor.f32 %v418_v41  ;;  %v513_v31 = vsub.f32 %v2032_v1, %v481_v5  ;;  %v900_v4 = vand.u32 2147483647, %v836_v59  ;;  %v899_v11 = vand.u32 2147483647, %v835_v3 }
  0xb2   : >> { %v2064_v8 = vadd.f32 %v1904_v57, %v2350_v56  ;;  %1389 = vmatprep.subr.bf16.mxu0 %v1388_v33  ;;  %v1087_v36 = vmul.f32 %v1023_v32, %v756_v6  ;;  %v1089_v46 = vmul.f32 %v1025_v10, %v758_v54  ;;  %v2351_v6 = vcvt.s32.f32 %v1803_v20 }
  0xb3   : >> { %v482_v9 = vmul.f32 16.0, %v450_v2  ;;  %v838_v50 = vsub.f32 %v450_v2, %v1907_v0  ;;  %v837_v12 = vsub.f32 %v450_v2, %v1913_v62  ;;  %v569_v29 = vsub.f32 %v513_v31, %v1902_v58 }
  0xb4   : >> { %v964_v30 = vsub.f32 1.0, %v900_v4  ;;  %v568_v35 = vsub.f32 %v513_v31, %v1910_v63  ;;  %v1390_v48 = vpack.c.bf16 %v1089_v46, %v1087_v36  ;;  %v963_v61 = vsub.f32 1.0, %v899_v11 }
  0xb5   : >> { %v514_v51 = vsub.f32 %v385_v43, %v482_v9  ;;  %v902_v44 = vand.u32 2147483647, %v838_v50  ;;  %v901_v42 = vand.u32 2147483647, %v837_v12  ;;  %v633_v52 = vand.u32 2147483647, %v569_v29 }
  0xb6   : >> { %v1028_v45 = vmax.f32 %v964_v30, 0.0  ;;  %v632_v38 = vand.u32 2147483647, %v568_v35  ;;  %1391 = vmatpush1.bf16.msra.mxu0 %v1390_v48  ;;  %v387_v54 = vadd.f32 %v1904_v57, %v2351_v6  ;;  %v1027_v49 = vmax.f32 %v963_v61, 0.0 }
  0xb7   : >> { %v571_v34 = vsub.f32 %v514_v51, %v1902_v58  ;;  %v570_v1 = vsub.f32 %v514_v51, %v1910_v63  ;;  %v966_v37 = vsub.f32 1.0, %v902_v44  ;;  %v965_v40 = vsub.f32 1.0, %v901_v42 }
  0xb8   : >> { %v697_v55 = vsub.f32 1.0, %v633_v52  ;;  %v696_v39 = vsub.f32 1.0, %v632_v38  ;;  %v419_v59 = vmul.f32 0.0625, %v2064_v8  ;;  %v420_v3 = vmul.f32 0.0625, %v387_v54 }
  0xb9   : >> { %v635_v60 = vand.u32 2147483647, %v571_v34  ;;  %v634_v43 = vand.u32 2147483647, %v570_v1  ;;  %v1030_v41 = vmax.f32 %v966_v37, 0.0  ;;  %v1029_v53 = vmax.f32 %v965_v40, 0.0 }
  0xba   : >> { %v761_v2 = vmax.f32 %v697_v55, 0.0  ;;  %v760_v5 = vmax.f32 %v696_v39, 0.0  ;;  %v2352_v32 = vcvt.s32.f32 %v1806_v21  ;;  %v2353_v9 = vcvt.s32.f32 %v1810_v22 }
  0xbb   : >> { %v699_v7 = vsub.f32 1.0, %v635_v60  ;;  %v698_v47 = vsub.f32 1.0, %v634_v43  ;;  %v451_v12 = vfloor.f32 %v419_v59  ;;  %v452_v36 = vfloor.f32 %v420_v3 }
  0xbc   : >> { %v388_v10 = vadd.f32 %v1904_v57, %v2352_v32  ;;  %v389_v31 = vadd.f32 %v1904_v57, %v2353_v9  ;;  %v1092_v50 = vmul.f32 %v1028_v45, %v761_v2  ;;  %v1091_v4 = vmul.f32 %v1027_v49, %v760_v5 }
  0xbd   : >> { %v763_v56 = vmax.f32 %v699_v7, 0.0  ;;  %v762_v33 = vmax.f32 %v698_v47, 0.0  ;;  %v483_v44 = vmul.f32 16.0, %v451_v12  ;;  %v484_v30 = vmul.f32 16.0, %v452_v36 }
  0xbe   : >> { %v421_v11 = vmul.f32 0.0625, %v388_v10  ;;  %v422_v29 = vmul.f32 0.0625, %v389_v31  ;;  %v840_v35 = vsub.f32 %v451_v12, %v1907_v0  ;;  %v842_v48 = vsub.f32 %v452_v36, %v1907_v0 }
  0xbf   : >> { %v1094_v46 = vmul.f32 %v1030_v41, %v763_v56  ;;  %v1093_v51 = vmul.f32 %v1029_v53, %v762_v33  ;;  %v839_v42 = vsub.f32 %v451_v12, %v1913_v62  ;;  %v841_v52 = vsub.f32 %v452_v36, %v1913_v62 }
  0xc0   : >> { %v515_v37 = vsub.f32 %v2064_v8, %v483_v44  ;;  %v516_v45 = vsub.f32 %v387_v54, %v484_v30  ;;  %v904_v38 = vand.u32 2147483647, %v840_v35  ;;  %v906_v60 = vand.u32 2147483647, %v842_v48 }
  0xc1   : >> { %v1392_v34 = vpack.c.bf16 %v1094_v46, %v1092_v50  ;;  %v1394_v1 = vpack.c.bf16 %v1093_v51, %v1091_v4  ;;  %v903_v43 = vand.u32 2147483647, %v839_v42  ;;  %v905_v61 = vand.u32 2147483647, %v841_v52 }
  0xc2   : >> { %v2088_v40 = vfloor.f32 %v421_v11  ;;  %v2090_v55 = vfloor.f32 %v422_v29  ;;  %v573_v41 = vsub.f32 %v515_v37, %v1902_v58  ;;  %v575_v39 = vsub.f32 %v516_v45, %v1902_v58 }
  0xc3   : >> { %1393 = vmatprep.subr.bf16.mxu0 %v1392_v34  ;;  %v968_v6 = vsub.f32 1.0, %v904_v38  ;;  %v970_v7 = vsub.f32 1.0, %v906_v60  ;;  %v572_v47 = vsub.f32 %v515_v37, %v1910_v63  ;;  %v574_v8 = vsub.f32 %v516_v45, %v1910_v63 }
  0xc4   : >> { %1395 = vmatpush1.bf16.msra.mxu0 %v1394_v1  ;;  %v967_v54 = vsub.f32 1.0, %v903_v43  ;;  %v969_v49 = vsub.f32 1.0, %v905_v61  ;;  %v637_v53 = vand.u32 2147483647, %v573_v41  ;;  %v639_v2 = vand.u32 2147483647, %v575_v39 }
  0xc5   : >> { %v1032_v5 = vmax.f32 %v968_v6, 0.0  ;;  %v1034_v59 = vmax.f32 %v970_v7, 0.0  ;;  %v636_v3 = vand.u32 2147483647, %v572_v47  ;;  %v638_v56 = vand.u32 2147483647, %v574_v8 }
  0xc6   : >> { %v1031_v33 = vmax.f32 %v967_v54, 0.0  ;;  %v1033_v32 = vmax.f32 %v969_v49, 0.0  ;;  %v701_v9 = vsub.f32 1.0, %v637_v53  ;;  %v703_v50 = vsub.f32 1.0, %v639_v2 }
  0xc7   : >> { %v485_v4 = vmul.f32 16.0, %v2088_v40  ;;  %v486_v12 = vmul.f32 16.0, %v2090_v55  ;;  %v700_v36 = vsub.f32 1.0, %v636_v3  ;;  %v702_v46 = vsub.f32 1.0, %v638_v56 }
  0xc8   : >> { %v844_v51 = vsub.f32 %v2088_v40, %v1907_v0  ;;  %v846_v11 = vsub.f32 %v2090_v55, %v1907_v0  ;;  %v765_v29 = vmax.f32 %v701_v9, 0.0  ;;  %v767_v44 = vmax.f32 %v703_v50, 0.0 }
  0xc9   : >> { %v517_v30 = vsub.f32 %v388_v10, %v485_v4  ;;  %v518_v35 = vsub.f32 %v389_v31, %v486_v12  ;;  %v764_v48 = vmax.f32 %v700_v36, 0.0  ;;  %v766_v34 = vmax.f32 %v702_v46, 0.0 }
  0xca   : >> { %v908_v1 = vand.u32 2147483647, %v844_v51  ;;  %v910_v42 = vand.u32 2147483647, %v846_v11  ;;  %v1096_v52 = vmul.f32 %v1032_v5, %v765_v29  ;;  %v1098_v37 = vmul.f32 %v1034_v59, %v767_v44 }
  0xcb   : >> { %v577_v45 = vsub.f32 %v517_v30, %v1902_v58  ;;  %v579_v38 = vsub.f32 %v518_v35, %v1902_v58  ;;  %v1095_v60 = vmul.f32 %v1031_v33, %v764_v48  ;;  %v1097_v43 = vmul.f32 %v1033_v32, %v766_v34 }
  0xcc   : >> { %v972_v61 = vsub.f32 1.0, %v908_v1  ;;  %v974_v41 = vsub.f32 1.0, %v910_v42  ;;  %v1396_v39 = vpack.c.bf16 %v1098_v37, %v1096_v52  ;;  %v576_v10 = vsub.f32 %v517_v30, %v1910_v63 }
  0xcd   : >> { %v641_v6 = vand.u32 2147483647, %v577_v45  ;;  %v643_v7 = vand.u32 2147483647, %v579_v38  ;;  %v1398_v31 = vpack.c.bf16 %v1097_v43, %v1095_v60  ;;  %v578_v54 = vsub.f32 %v518_v35, %v1910_v63 }
  0xce   : >> { %v1036_v47 = vmax.f32 %v972_v61, 0.0  ;;  %v1038_v8 = vmax.f32 %v974_v41, 0.0  ;;  %1397 = vmatprep.subr.bf16.mxu0 %v1396_v39  ;;  %v640_v2 = vand.u32 2147483647, %v576_v10  ;;  %v843_v5 = vsub.f32 %v2088_v40, %v1913_v62 }
  0xcf   : >> { %v705_v49 = vsub.f32 1.0, %v641_v6  ;;  %v707_v53 = vsub.f32 1.0, %v643_v7  ;;  %1399 = vmatpush1.bf16.msra.mxu0 %v1398_v31  ;;  %v642_v59 = vand.u32 2147483647, %v578_v54  ;;  %v845_v3 = vsub.f32 %v2090_v55, %v1913_v62 }
  0xd0   : >> { %v2354_v56 = vcvt.s32.f32 %v1813_v23  ;;  %v2355_v32 = vcvt.s32.f32 %v1816_v24  ;;  %v704_v12 = vsub.f32 1.0, %v640_v2  ;;  %v907_v36 = vand.u32 2147483647, %v843_v5 }
  0xd1   : >> { %v769_v50 = vmax.f32 %v705_v49, 0.0  ;;  %v771_v4 = vmax.f32 %v707_v53, 0.0  ;;  %v706_v46 = vsub.f32 1.0, %v642_v59  ;;  %v909_v51 = vand.u32 2147483647, %v845_v3 }
  0xd2   : >> { %v390_v33 = vadd.f32 %v1904_v57, %v2354_v56  ;;  %v391_v9 = vadd.f32 %v1904_v57, %v2355_v32  ;;  %v768_v30 = vmax.f32 %v704_v12, 0.0  ;;  %v971_v55 = vsub.f32 1.0, %v907_v36 }
  0xd3   : >> { %v1100_v29 = vmul.f32 %v1036_v47, %v769_v50  ;;  %v1102_v44 = vmul.f32 %v1038_v8, %v771_v4  ;;  %v770_v35 = vmax.f32 %v706_v46, 0.0  ;;  %v973_v48 = vsub.f32 1.0, %v909_v51 }
  0xd4   : >> { %v423_v40 = vmul.f32 0.0625, %v390_v33  ;;  %v424_v11 = vmul.f32 0.0625, %v391_v9  ;;  %v1035_v52 = vmax.f32 %v971_v55, 0.0  ;;  %v2356_v37 = vcvt.s32.f32 %v1819_v25 }
  0xd5   : >> { %v1400_v42 = vpack.c.bf16 %v1102_v44, %v1100_v29  ;;  %v2357_v38 = vcvt.s32.f32 %v1824_v26  ;;  %v1037_v43 = vmax.f32 %v973_v48, 0.0  ;;  %v2358_v59 = vcvt.s32.f32 %v1827_v27 }
  0xd6   : >> { %v455_v34 = vfloor.f32 %v423_v40  ;;  %v456_v1 = vfloor.f32 %v424_v11  ;;  %v392_v45 = vadd.f32 %v1904_v57, %v2356_v37  ;;  %v1099_v6 = vmul.f32 %v1035_v52, %v768_v30 }
  0xd7   : >> { %v2122_v60 = vadd.f32 %v1904_v57, %v2357_v38  ;;  %1401 = vmatprep.subr.bf16.mxu0 %v1400_v42  ;;  %v1101_v47 = vmul.f32 %v1037_v43, %v770_v35  ;;  %v2131_v3 = vadd.f32 %v1904_v57, %v2358_v59  ;;  %v2359_v38 = vcvt.s32.f32 %v1830_v28 }
  0xd8   : >> { %v487_v61 = vmul.f32 16.0, %v455_v34  ;;  %v488_v41 = vmul.f32 16.0, %v456_v1  ;;  %v848_v39 = vsub.f32 %v455_v34, %v1907_v0  ;;  %v850_v7 = vsub.f32 %v456_v1, %v1907_v0 }
  0xd9   : >> { %v847_v10 = vsub.f32 %v455_v34, %v1913_v62  ;;  %v849_v31 = vsub.f32 %v456_v1, %v1913_v62  ;;  %v1402_v56 = vpack.c.bf16 %v1101_v47, %v1099_v6  ;;  %v425_v1 = vmul.f32 0.0625, %v392_v45 }
  0xda   : >> { %v519_v8 = vsub.f32 %v390_v33, %v487_v61  ;;  %v520_v54 = vsub.f32 %v391_v9, %v488_v41  ;;  %v912_v49 = vand.u32 2147483647, %v848_v39  ;;  %v914_v53 = vand.u32 2147483647, %v850_v7 }
  0xdb   : >> { %v911_v2 = vand.u32 2147483647, %v847_v10  ;;  %v913_v5 = vand.u32 2147483647, %v849_v31  ;;  %1403 = vmatpush1.bf16.msra.mxu0 %v1402_v56  ;;  %v426_v37 = vmul.f32 0.0625, %v2122_v60  ;;  %v2141_v43 = vadd.f32 %v1904_v57, %v2359_v38 }
  0xdc   : >> { %v581_v32 = vsub.f32 %v519_v8, %v1902_v58  ;;  %v583_v50 = vsub.f32 %v520_v54, %v1902_v58  ;;  %v976_v4 = vsub.f32 1.0, %v912_v49  ;;  %v978_v12 = vsub.f32 1.0, %v914_v53 }
  0xdd   : >> { %v580_v36 = vsub.f32 %v519_v8, %v1910_v63  ;;  %v582_v33 = vsub.f32 %v520_v54, %v1910_v63  ;;  %v975_v9 = vsub.f32 1.0, %v911_v2  ;;  %v977_v11 = vsub.f32 1.0, %v913_v5 }
  0xde   : >> { %v645_v46 = vand.u32 2147483647, %v581_v32  ;;  %v647_v51 = vand.u32 2147483647, %v583_v50  ;;  %v1040_v40 = vmax.f32 %v976_v4, 0.0  ;;  %v1042_v29 = vmax.f32 %v978_v12, 0.0 }
  0xdf   : >> { %v644_v44 = vand.u32 2147483647, %v580_v36  ;;  %v646_v30 = vand.u32 2147483647, %v582_v33  ;;  %v1039_v55 = vmax.f32 %v975_v9, 0.0  ;;  %v1041_v34 = vmax.f32 %v977_v11, 0.0 }
  0xe0   : >> { %v709_v35 = vsub.f32 1.0, %v645_v46  ;;  %v711_v48 = vsub.f32 1.0, %v647_v51  ;;  %v457_v39 = vfloor.f32 %v425_v1  ;;  %v427_v6 = vmul.f32 0.0625, %v2131_v3 }
  0xe1   : >> { %v708_v42 = vsub.f32 1.0, %v644_v44  ;;  %v710_v52 = vsub.f32 1.0, %v646_v30  ;;  %v458_v31 = vfloor.f32 %v426_v37  ;;  %v428_v47 = vmul.f32 0.0625, %v2141_v43 }
  0xe2   : >> { %v773_v61 = vmax.f32 %v709_v35, 0.0  ;;  %v775_v41 = vmax.f32 %v711_v48, 0.0  ;;  %v489_v49 = vmul.f32 16.0, %v457_v39  ;;  %v852_v53 = vsub.f32 %v457_v39, %v1907_v0 }
  0xe3   : >> { %v772_v7 = vmax.f32 %v708_v42, 0.0  ;;  %v774_v10 = vmax.f32 %v710_v52, 0.0  ;;  %v490_v59 = vmul.f32 16.0, %v458_v31  ;;  %v854_v56 = vsub.f32 %v458_v31, %v1907_v0 }
  0xe4   : >> { %v1104_v8 = vmul.f32 %v1040_v40, %v773_v61  ;;  %v1106_v54 = vmul.f32 %v1042_v29, %v775_v41  ;;  %v521_v50 = vsub.f32 %v392_v45, %v489_v49  ;;  %v916_v4 = vand.u32 2147483647, %v852_v53 }
  0xe5   : >> { %v1103_v2 = vmul.f32 %v1039_v55, %v772_v7  ;;  %v1105_v5 = vmul.f32 %v1041_v34, %v774_v10  ;;  %v851_v12 = vsub.f32 %v457_v39, %v1913_v62  ;;  %v522_v33 = vsub.f32 %v2122_v60, %v490_v59 }
  0xe6   : >> { %v1404_v32 = vpack.c.bf16 %v1106_v54, %v1104_v8  ;;  %v918_v9 = vand.u32 2147483647, %v854_v56  ;;  %v853_v46 = vsub.f32 %v458_v31, %v1913_v62  ;;  %v585_v51 = vsub.f32 %v521_v50, %v1902_v58 }
  0xe7   : >> { %v1406_v36 = vpack.c.bf16 %v1105_v5, %v1103_v2  ;;  %v980_v40 = vsub.f32 1.0, %v916_v4  ;;  %v584_v11 = vsub.f32 %v521_v50, %v1910_v63  ;;  %v915_v29 = vand.u32 2147483647, %v851_v12 }
  0xe8   : >> { %1405 = vmatprep.subr.bf16.mxu0 %v1404_v32  ;;  %v587_v44 = vsub.f32 %v522_v33, %v1902_v58  ;;  %v982_v45 = vsub.f32 1.0, %v918_v9  ;;  %v586_v30 = vsub.f32 %v522_v33, %v1910_v63  ;;  %v917_v55 = vand.u32 2147483647, %v853_v46 }
  0xe9   : >> { %1407 = vmatpush1.bf16.msra.mxu0 %v1406_v36  ;;  %v649_v35 = vand.u32 2147483647, %v585_v51  ;;  %v1044_v48 = vmax.f32 %v980_v40, 0.0  ;;  %v648_v60 = vand.u32 2147483647, %v584_v11  ;;  %v979_v34 = vsub.f32 1.0, %v915_v29 }
  0xea   : >> { %v651_v1 = vand.u32 2147483647, %v587_v44  ;;  %v1046_v42 = vmax.f32 %v982_v45, 0.0  ;;  %v650_v52 = vand.u32 2147483647, %v586_v30  ;;  %v981_v37 = vsub.f32 1.0, %v917_v55 }
  0xeb   : >> { %v713_v38 = vsub.f32 1.0, %v649_v35  ;;  %v712_v61 = vsub.f32 1.0, %v648_v60  ;;  %v1043_v41 = vmax.f32 %v979_v34, 0.0  ;;  %v459_v39 = vfloor.f32 %v427_v6 }
  0xec   : >> { %v715_v7 = vsub.f32 1.0, %v651_v1  ;;  %v714_v10 = vsub.f32 1.0, %v650_v52  ;;  %v1045_v31 = vmax.f32 %v981_v37, 0.0  ;;  %v460_v8 = vfloor.f32 %v428_v47 }
  0xed   : >> { %v777_v54 = vmax.f32 %v713_v38, 0.0  ;;  %v776_v49 = vmax.f32 %v712_v61, 0.0  ;;  %v491_v53 = vmul.f32 16.0, %v459_v39  ;;  %v856_v2 = vsub.f32 %v459_v39, %v1907_v0  ;;  %v2360_v38 = vld [vmem:[#allocation21_spill] sm:$0xff] }
  0xee   : >> { %v779_v5 = vmax.f32 %v715_v7, 0.0  ;;  %v778_v59 = vmax.f32 %v714_v10, 0.0  ;;  %v492_v56 = vmul.f32 16.0, %v460_v8  ;;  %v858_v32 = vsub.f32 %v460_v8, %v1907_v0 }
  0xef   : >> { %v1108_v50 = vmul.f32 %v1044_v48, %v777_v54  ;;  %v1107_v4 = vmul.f32 %v1043_v41, %v776_v49  ;;  %v523_v12 = vsub.f32 %v2131_v3, %v491_v53  ;;  %v920_v36 = vand.u32 2147483647, %v856_v2 }
  0xf0   : >> { %v1110_v6 = vmul.f32 %v1046_v42, %v779_v5  ;;  %v1109_v33 = vmul.f32 %v1045_v31, %v778_v59  ;;  %v524_v9 = vsub.f32 %v2141_v43, %v492_v56  ;;  %v922_v47 = vand.u32 2147483647, %v858_v32  ;;  %v2362_v31 = vld [vmem:[#allocation22_spill] sm:$0xff] }
  0xf1   : >> { %v589_v46 = vsub.f32 %v523_v12, %v1902_v58  ;;  %v984_v51 = vsub.f32 1.0, %v920_v36  ;;  %v588_v40 = vsub.f32 %v523_v12, %v1910_v63  ;;  %v855_v11 = vsub.f32 %v459_v39, %v1913_v62 }
  0xf2   : >> { %v1408_v29 = vpack.c.bf16 %v1110_v6, %v1108_v50  ;;  %v1410_v44 = vpack.c.bf16 %v1109_v33, %v1107_v4  ;;  %v591_v45 = vsub.f32 %v524_v9, %v1902_v58  ;;  %v986_v30 = vsub.f32 1.0, %v922_v47  ;;  %v2364_v6 = vld [vmem:[#allocation23_spill] sm:$0xff] }
  0xf3   : >> { %v653_v55 = vand.u32 2147483647, %v589_v46  ;;  %v1048_v3 = vmax.f32 %v984_v51, 0.0  ;;  %v590_v35 = vsub.f32 %v524_v9, %v1910_v63  ;;  %v652_v48 = vand.u32 2147483647, %v588_v40 }
  0xf4   : >> { %1409 = vmatprep.subr.bf16.mxu0 %v1408_v29  ;;  %v655_v43 = vand.u32 2147483647, %v591_v45  ;;  %v1050_v60 = vmax.f32 %v986_v30, 0.0  ;;  %v857_v34 = vsub.f32 %v460_v8, %v1913_v62  ;;  %v919_v1 = vand.u32 2147483647, %v855_v11  ;;  %v2366_v45 = vld [vmem:[#allocation24_spill] sm:$0xff] }
  0xf5   : >> { %1411 = vmatpush1.bf16.msra.mxu0 %v1410_v44  ;;  %v717_v42 = vsub.f32 1.0, %v653_v55  ;;  %v654_v52 = vand.u32 2147483647, %v590_v35  ;;  %v716_v37 = vsub.f32 1.0, %v652_v48  ;;  %v2361_v61 = vcvt.s32.f32 %v2360_v38 }
  0xf6   : >> { %v719_v39 = vsub.f32 1.0, %v655_v43  ;;  %v921_v7 = vand.u32 2147483647, %v857_v34  ;;  %v983_v10 = vsub.f32 1.0, %v919_v1  ;;  %v2363_v54 = vcvt.s32.f32 %v2362_v31 }
  0xf7   : >> { %v396_v41 = vadd.f32 %v1904_v57, %v2361_v61  ;;  %v781_v53 = vmax.f32 %v717_v42, 0.0  ;;  %v718_v2 = vsub.f32 1.0, %v654_v52  ;;  %v780_v5 = vmax.f32 %v716_v37, 0.0 }
  0xf8   : >> { %v397_v49 = vadd.f32 %v1904_v57, %v2363_v54  ;;  %v783_v59 = vmax.f32 %v719_v39, 0.0  ;;  %v985_v56 = vsub.f32 1.0, %v921_v7  ;;  %v1047_v32 = vmax.f32 %v983_v10, 0.0 }
  0xf9   : >> { %v429_v8 = vmul.f32 0.0625, %v396_v41  ;;  %v1112_v4 = vmul.f32 %v1048_v3, %v781_v53  ;;  %v782_v12 = vmax.f32 %v718_v2, 0.0  ;;  %v2365_v33 = vcvt.s32.f32 %v2364_v6 }
  0xfa   : >> { %v430_v50 = vmul.f32 0.0625, %v397_v49  ;;  %v1114_v47 = vmul.f32 %v1050_v60, %v783_v59  ;;  %v1049_v46 = vmax.f32 %v985_v56, 0.0  ;;  %v1111_v51 = vmul.f32 %v1047_v32, %v780_v5 }
  0xfb   : >> { %v461_v36 = vfloor.f32 %v429_v8  ;;  %v398_v9 = vadd.f32 %v1904_v57, %v2365_v33  ;;  %v2367_v30 = vcvt.s32.f32 %v2366_v45 }
  0xfc   : >> { %v462_v40 = vfloor.f32 %v430_v50  ;;  %v1412_v3 = vpack.c.bf16 %v1114_v47, %v1112_v4  ;;  %v1113_v35 = vmul.f32 %v1049_v46, %v782_v12 }
  0xfd   : >> { %v493_v11 = vmul.f32 16.0, %v461_v36  ;;  %v860_v29 = vsub.f32 %v461_v36, %v1907_v0  ;;  %v859_v44 = vsub.f32 %v461_v36, %v1913_v62  ;;  %v399_v55 = vadd.f32 %v1904_v57, %v2367_v30 }
  0xfe   : >> { %v494_v48 = vmul.f32 16.0, %v462_v40  ;;  %v862_v43 = vsub.f32 %v462_v40, %v1907_v0  ;;  %v861_v60 = vsub.f32 %v462_v40, %v1913_v62  ;;  %1413 = vmatprep.subr.bf16.mxu0 %v1412_v3  ;;  %v1414_v52 = vpack.c.bf16 %v1113_v35, %v1111_v51  ;;  %v2368_v40 = vld [vmem:[#allocation25_spill] sm:$0xff]  ;;  %v2370_v3 = vld [vmem:[#allocation26_spill] sm:$0xff] }
  0xff   : >> { %v525_v34 = vsub.f32 %v396_v41, %v493_v11  ;;  %v924_v1 = vand.u32 2147483647, %v860_v29  ;;  %v923_v42 = vand.u32 2147483647, %v859_v44  ;;  %v431_v61 = vmul.f32 0.0625, %v398_v9 }
 0x100   : >> { %v526_v37 = vsub.f32 %v397_v49, %v494_v48  ;;  %v926_v38 = vand.u32 2147483647, %v862_v43  ;;  %v925_v31 = vand.u32 2147483647, %v861_v60  ;;  %1415 = vmatpush1.bf16.msra.mxu0 %v1414_v52  ;;  %v432_v33 = vmul.f32 0.0625, %v399_v55 }
 0x101   : >> { %v593_v39 = vsub.f32 %v525_v34, %v1902_v58  ;;  %v988_v7 = vsub.f32 1.0, %v924_v1  ;;  %v592_v10 = vsub.f32 %v525_v34, %v1910_v63  ;;  %v987_v2 = vsub.f32 1.0, %v923_v42 }
 0x102   : >> { %v595_v54 = vsub.f32 %v526_v37, %v1902_v58  ;;  %v990_v53 = vsub.f32 1.0, %v926_v38  ;;  %v594_v41 = vsub.f32 %v526_v37, %v1910_v63  ;;  %v989_v56 = vsub.f32 1.0, %v925_v31 }
 0x103   : >> { %v657_v5 = vand.u32 2147483647, %v593_v39  ;;  %v1052_v8 = vmax.f32 %v988_v7, 0.0  ;;  %v656_v59 = vand.u32 2147483647, %v592_v10  ;;  %v1051_v4 = vmax.f32 %v987_v2, 0.0 }
 0x104   : >> { %v659_v49 = vand.u32 2147483647, %v595_v54  ;;  %v1054_v32 = vmax.f32 %v990_v53, 0.0  ;;  %v658_v50 = vand.u32 2147483647, %v594_v41  ;;  %v1053_v6 = vmax.f32 %v989_v56, 0.0 }
 0x105   : >> { %v721_v12 = vsub.f32 1.0, %v657_v5  ;;  %v720_v36 = vsub.f32 1.0, %v656_v59  ;;  %v463_v51 = vfloor.f32 %v431_v61  ;;  %v2369_v11 = vcvt.s32.f32 %v2368_v40 }
 0x106   : >> { %v723_v47 = vsub.f32 1.0, %v659_v49  ;;  %v722_v46 = vsub.f32 1.0, %v658_v50  ;;  %v464_v30 = vfloor.f32 %v432_v33  ;;  %v2371_v35 = vcvt.s32.f32 %v2370_v3 }
 0x107   : >> { %v400_v29 = vadd.f32 %v1904_v57, %v2369_v11  ;;  %v785_v44 = vmax.f32 %v721_v12, 0.0  ;;  %v784_v45 = vmax.f32 %v720_v36, 0.0  ;;  %v495_v1 = vmul.f32 16.0, %v463_v51 }
 0x108   : >> { %v401_v48 = vadd.f32 %v1904_v57, %v2371_v35  ;;  %v787_v43 = vmax.f32 %v723_v47, 0.0  ;;  %v786_v34 = vmax.f32 %v722_v46, 0.0  ;;  %v864_v60 = vsub.f32 %v463_v51, %v1907_v0 }
 0x109   : >> { %v1116_v42 = vmul.f32 %v1052_v8, %v785_v44  ;;  %v1115_v52 = vmul.f32 %v1051_v4, %v784_v45  ;;  %v496_v37 = vmul.f32 16.0, %v464_v30  ;;  %v866_v38 = vsub.f32 %v464_v30, %v1907_v0 }
 0x10a   : >> { %v1118_v61 = vmul.f32 %v1054_v32, %v787_v43  ;;  %v1117_v39 = vmul.f32 %v1053_v6, %v786_v34  ;;  %v527_v7 = vsub.f32 %v398_v9, %v495_v1  ;;  %v928_v10 = vand.u32 2147483647, %v864_v60 }
 0x10b   : >> { %v528_v31 = vsub.f32 %v399_v55, %v496_v37  ;;  %v930_v54 = vand.u32 2147483647, %v866_v38  ;;  %v863_v53 = vsub.f32 %v463_v51, %v1913_v62  ;;  %v865_v41 = vsub.f32 %v464_v30, %v1913_v62 }
 0x10c   : >> { %v1416_v2 = vpack.c.bf16 %v1118_v61, %v1116_v42  ;;  %v1418_v5 = vpack.c.bf16 %v1117_v39, %v1115_v52  ;;  %v597_v59 = vsub.f32 %v527_v7, %v1902_v58  ;;  %v992_v56 = vsub.f32 1.0, %v928_v10 }
 0x10d   : >> { %v599_v8 = vsub.f32 %v528_v31, %v1902_v58  ;;  %v994_v49 = vsub.f32 1.0, %v930_v54  ;;  %v596_v50 = vsub.f32 %v527_v7, %v1910_v63  ;;  %v598_v32 = vsub.f32 %v528_v31, %v1910_v63 }
 0x10e   : >> { %1417 = vmatprep.subr.bf16.mxu0 %v1416_v2  ;;  %v661_v9 = vand.u32 2147483647, %v597_v59  ;;  %v1056_v55 = vmax.f32 %v992_v56, 0.0  ;;  %v927_v4 = vand.u32 2147483647, %v863_v53  ;;  %v433_v12 = vmul.f32 0.0625, %v400_v29 }
 0x10f   : >> { %1419 = vmatpush1.bf16.msra.mxu0 %v1418_v5  ;;  %v663_v36 = vand.u32 2147483647, %v599_v8  ;;  %v1058_v6 = vmax.f32 %v994_v49, 0.0  ;;  %v660_v33 = vand.u32 2147483647, %v596_v50  ;;  %v434_v47 = vmul.f32 0.0625, %v401_v48 }
 0x110   : >> { %v725_v46 = vsub.f32 1.0, %v661_v9  ;;  %v662_v51 = vand.u32 2147483647, %v598_v32  ;;  %v929_v40 = vand.u32 2147483647, %v865_v41  ;;  %v991_v11 = vsub.f32 1.0, %v927_v4 }
 0x111   : >> { %v727_v44 = vsub.f32 1.0, %v663_v36  ;;  %v724_v45 = vsub.f32 1.0, %v660_v33  ;;  %v465_v30 = vfloor.f32 %v433_v12  ;;  %v466_v3 = vfloor.f32 %v434_v47 }
 0x112   : >> { %v789_v35 = vmax.f32 %v725_v46, 0.0  ;;  %v726_v43 = vsub.f32 1.0, %v662_v51  ;;  %v993_v34 = vsub.f32 1.0, %v929_v40  ;;  %v1055_v1 = vmax.f32 %v991_v11, 0.0 }
 0x113   : >> { %v791_v60 = vmax.f32 %v727_v44, 0.0  ;;  %v788_v42 = vmax.f32 %v724_v45, 0.0  ;;  %v497_v52 = vmul.f32 16.0, %v465_v30  ;;  %v498_v37 = vmul.f32 16.0, %v466_v3 }
 0x114   : >> { %v1120_v38 = vmul.f32 %v1056_v55, %v789_v35  ;;  %v790_v61 = vmax.f32 %v726_v43, 0.0  ;;  %v1057_v39 = vmax.f32 %v993_v34, 0.0  ;;  %v868_v7 = vsub.f32 %v465_v30, %v1907_v0  ;;  %v2372_v43 = vld [vmem:[#allocation27_spill] sm:$0xff] }
 0x115   : >> { %v1122_v10 = vmul.f32 %v1058_v6, %v791_v60  ;;  %v1119_v31 = vmul.f32 %v1055_v1, %v788_v42  ;;  %v529_v54 = vsub.f32 %v400_v29, %v497_v52  ;;  %v530_v53 = vsub.f32 %v401_v48, %v498_v37  ;;  %v2211_v60 = vld [vmem:[%s1134_s9] sm:$0xff] }
 0x116   : >> { %v1121_v41 = vmul.f32 %v1057_v39, %v790_v61  ;;  %v870_v2 = vsub.f32 %v466_v3, %v1907_v0  ;;  %v932_v5 = vand.u32 2147483647, %v868_v7  ;;  %v867_v59 = vsub.f32 %v465_v30, %v1913_v62  ;;  %v2374_v39 = vld [vmem:[#allocation28_spill] sm:$0xff] }
 0x117   : >> { %v1420_v56 = vpack.c.bf16 %v1122_v10, %v1120_v38  ;;  %v601_v8 = vsub.f32 %v529_v54, %v1902_v58  ;;  %v603_v49 = vsub.f32 %v530_v53, %v1902_v58  ;;  %v600_v50 = vsub.f32 %v529_v54, %v1910_v63 }
 0x118   : >> { %v1422_v32 = vpack.c.bf16 %v1121_v41, %v1119_v31  ;;  %v934_v9 = vand.u32 2147483647, %v870_v2  ;;  %v996_v55 = vsub.f32 1.0, %v932_v5  ;;  %v602_v29 = vsub.f32 %v530_v53, %v1910_v63 }
 0x119   : >> { %1421 = vmatprep.subr.bf16.mxu0 %v1420_v56  ;;  %v665_v48 = vand.u32 2147483647, %v601_v8  ;;  %v667_v4 = vand.u32 2147483647, %v603_v49  ;;  %v664_v12 = vand.u32 2147483647, %v600_v50  ;;  %v869_v36 = vsub.f32 %v466_v3, %v1913_v62 }
 0x11a   : >> { %1423 = vmatpush1.bf16.msra.mxu0 %v1422_v32  ;;  %v998_v6 = vsub.f32 1.0, %v934_v9  ;;  %v1060_v33 = vmax.f32 %v996_v55, 0.0  ;;  %v666_v47 = vand.u32 2147483647, %v602_v29  ;;  %v931_v46 = vand.u32 2147483647, %v867_v59 }
 0x11b   : >> { %v729_v51 = vsub.f32 1.0, %v665_v48  ;;  %v731_v40 = vsub.f32 1.0, %v667_v4  ;;  %v728_v11 = vsub.f32 1.0, %v664_v12  ;;  %v933_v44 = vand.u32 2147483647, %v869_v36 }
 0x11c   : >> { %v1062_v45 = vmax.f32 %v998_v6, 0.0  ;;  %v730_v30 = vsub.f32 1.0, %v666_v47  ;;  %v995_v35 = vsub.f32 1.0, %v931_v46  ;;  %v2373_v34 = vcvt.s32.f32 %v2372_v43 }
 0x11d   : >> { %v793_v3 = vmax.f32 %v729_v51, 0.0  ;;  %v795_v42 = vmax.f32 %v731_v40, 0.0  ;;  %v792_v52 = vmax.f32 %v728_v11, 0.0  ;;  %v997_v37 = vsub.f32 1.0, %v933_v44 }
 0x11e   : >> { %v402_v1 = vadd.f32 %v1904_v57, %v2373_v34  ;;  %v794_v38 = vmax.f32 %v730_v30, 0.0  ;;  %v1059_v61 = vmax.f32 %v995_v35, 0.0  ;;  %v2375_v7 = vcvt.s32.f32 %v2374_v39 }
 0x11f   : >> { %v1124_v54 = vmul.f32 %v1060_v33, %v793_v3  ;;  %v1126_v53 = vmul.f32 %v1062_v45, %v795_v42  ;;  %v1061_v41 = vmax.f32 %v997_v37, 0.0  ;;  %v1138_v2 = vcombine.high %v2211_v60, %v2211_v60 }
 0x120   : >> { %v403_v10 = vadd.f32 %v1904_v57, %v2375_v7  ;;  %v435_v31 = vmul.f32 0.0625, %v402_v1  ;;  %v1123_v5 = vmul.f32 %v1059_v61, %v792_v52 }
 0x121   : >> { %v1424_v8 = vpack.c.bf16 %v1126_v53, %v1124_v54  ;;  %v1125_v49 = vmul.f32 %v1061_v41, %v794_v38  ;;  %1204 = vmatprep.mubr.f32.mxu0 %v1138_v2 }
 0x122   : >> { %v436_v59 = vmul.f32 0.0625, %v403_v10  ;;  %v467_v56 = vfloor.f32 %v435_v31 }
 0x123   : >> { %1425 = vmatprep.subr.bf16.mxu0 %v1424_v8  ;;  %v1426_v57 = vpack.c.bf16 %v1125_v49, %v1123_v5  ;;  %v1136_v8 = vld [vmem:[#allocation2] sm:$0xff] }
 0x124   : >> { %v468_v50 = vfloor.f32 %v436_v59  ;;  %v499_v32 = vmul.f32 16.0, %v467_v56  ;;  %v872_v9 = vsub.f32 %v467_v56, %v1907_v0  ;;  %v871_v55 = vsub.f32 %v467_v56, %v1913_v62 }
 0x125   : >> { %1427 = vmatpush1.bf16.msra.mxu0 %v1426_v57 }
 0x126   : >> { %v500_v29 = vmul.f32 16.0, %v468_v50  ;;  %v531_v48 = vsub.f32 %v402_v1, %v499_v32  ;;  %v874_v4 = vsub.f32 %v468_v50, %v1907_v0  ;;  %v936_v12 = vand.u32 2147483647, %v872_v9 }
 0x127   : >> { %v873_v36 = vsub.f32 %v468_v50, %v1913_v62  ;;  %v935_v6 = vand.u32 2147483647, %v871_v55 }
 0x128   : >> { %v532_v33 = vsub.f32 %v403_v10, %v500_v29  ;;  %v605_v47 = vsub.f32 %v531_v48, %v1902_v58  ;;  %v938_v46 = vand.u32 2147483647, %v874_v4  ;;  %v1000_v51 = vsub.f32 1.0, %v936_v12 }
 0x129   : >> { %v604_v40 = vsub.f32 %v531_v48, %v1910_v63  ;;  %v937_v11 = vand.u32 2147483647, %v873_v36  ;;  %v999_v44 = vsub.f32 1.0, %v935_v6 }
 0x12a   : >> { %v607_v45 = vsub.f32 %v532_v33, %v1902_v58  ;;  %v669_v30 = vand.u32 2147483647, %v605_v47  ;;  %v1002_v35 = vsub.f32 1.0, %v938_v46  ;;  %v606_v0 = vsub.f32 %v532_v33, %v1910_v63 }
 0x12b   : >> { %v668_v43 = vand.u32 2147483647, %v604_v40  ;;  %v1001_v34 = vsub.f32 1.0, %v937_v11  ;;  %v1064_v3 = vmax.f32 %v1000_v51, 0.0  ;;  %v1063_v37 = vmax.f32 %v999_v44, 0.0 }
 0x12c   : >> { %v671_v1 = vand.u32 2147483647, %v607_v45  ;;  %v733_v62 = vsub.f32 1.0, %v669_v30  ;;  %v670_v42 = vand.u32 2147483647, %v606_v0  ;;  %v1066_v39 = vmax.f32 %v1002_v35, 0.0 }
 0x12d   : >> { %v732_v52 = vsub.f32 1.0, %v668_v43  ;;  %v1065_v31 = vmax.f32 %v1001_v34, 0.0 }
 0x12e   : >> { %v735_v38 = vsub.f32 1.0, %v671_v1  ;;  %v797_v61 = vmax.f32 %v733_v62, 0.0  ;;  %v734_v7 = vsub.f32 1.0, %v670_v42 }
 0x12f   : >> { %v796_v10 = vmax.f32 %v732_v52, 0.0 }
 0x130   : >> { %v799_v54 = vmax.f32 %v735_v38, 0.0  ;;  %v1128_v58 = vmul.f32 %v1064_v3, %v797_v61  ;;  %v798_v53 = vmax.f32 %v734_v7, 0.0 }
 0x131   : >> { %v1127_v41 = vmul.f32 %v1063_v37, %v796_v10 }
 0x132   : >> { %v1130_v2 = vmul.f32 %v1066_v39, %v799_v54  ;;  %v1129_v63 = vmul.f32 %v1065_v31, %v798_v53 }
 0x134   : >> { %v1428_v5 = vpack.c.bf16 %v1130_v2, %v1128_v58  ;;  %v1430_v59 = vpack.c.bf16 %v1129_v63, %v1127_v41 }
 0x136   : >> { %1429 = vmatprep.subr.bf16.mxu0 %v1428_v5 }
 0x137   : >> { %1431 = vmatpush1.bf16.msra.mxu0 %v1430_v59 }
 0x13a   : >> { %1205 = vmatmul.mubr.f32.vlgmr.msra.gmra.mrb[0].mxu0 %v2211_v60 }
 0x20d   : >> { %v1206_v56 = vpop.f32.mrb[0].mxu0  ;;  %367 = sbr.rel (!%p364_p2) target bundleno = 96 (0x60), region = 90 }
 0x20e   : >> { %v1208_v49 = vpop.f32.mrb[1].mxu0 }
 0x20f   : >> { %v1213_v50 = vcombine.low %v1206_v56, %v1208_v49 }
 0x211   : >> { %v1215_v32 = vadd.f32 %v1213_v50, %v1136_v8 }
 0x213   : >> { %1216 = vst [vmem:[#allocation2] sm:$0xff] %v1215_v32 }
 0x214 PF:  {}
 0x21a   : > { %v1217_v9 = vld [vmem:[#allocation2] sm:$0xff] }
 0x21b   : > { %1218 = vst [vmem:[%s1747_s18] sm:$0xff] %v1217_v9 }
 0x21c PF: > { %s1367_s15 = sshll.u32 %s1612_s12, 7  ;;  %s1236_s25 = sshll.u32 %s1747_s18, 4  ;;  %s1237_s25 = int_to_ptr.vmem [resolvable:$true] %s1236_s25 }
 0x21d   : > { %s2236_s24 = scalar_lea.hbm %s2284_s6, %s1367_s15  ;;  %s1220_s28 = scalar_lea.sflag [#allocation8], %s240_s23 }
 0x21e   : > { %s1536_s29 = scalar_lea.vmem %s1237_s25, 128  ;;  %s1630_s1 = smov [#allocation7]  }
 0x21f   : > { %p1537_p3 = scmp.ne.s32.totalorder %s1237_s25, %s1536_s29  ;;  %s1540_s26 = sshll.u32 %s1630_s1, 4  ;;  %s1541_s26 = int_to_ptr.vmem [resolvable:$false] %s1540_s26 }
 0x220   : > { %s1542_s27 = scalar_lea.vmem %s1541_s26, 256  ;;  %p1543_p7 = scmp.lt.s32.totalorder %s1237_s25, %s1541_s26 }
 0x221   : > { %p1538_p4 = pnand %p1537_p3, %p1715_p5  ;;  %p1544_p8 = scmp.lt.s32.totalorder %s1542_s27, %s1536_s29 }
 0x223   : > { %p1539_p6 = pneg %p1538_p4  ;;  %p1545_p10 = por %p1544_p8, %p1543_p7 }
 0x225   : > { %p1546_p11 = pnand %p1545_p10, %p1539_p6 }
 0x227   : > { %1549 = shalt.err (!%p1546_p11)
}
 0x228   : > { %s1550_s12 = scalar_lea.hbm %s2236_s24, 128  ;;  %s1554_s0 = scalar_lea.hbm %s2284_s6, 256 }
 0x229   : > { %p1551_p12 = scmp.ne.s32.totalorder %s2236_s24, %s1550_s12  ;;  %p1555_p1 = scmp.lt.u32.totalorder %s2236_s24, %s2284_s6 }
 0x22a   : > { %p1556_p2 = scmp.lt.u32.totalorder %s1554_s0, %s1550_s12  ;;  %p1558_p4 = scmp.lt.u32.totalorder %s1550_s12, %s2236_s24 }
 0x22b   : > { %p1552_p13 = pnand %p1551_p12, %p1715_p5 }
 0x22c   : > { %p1557_p3 = por %p1556_p2, %p1555_p1 }
 0x22d   : > { %p1553_p0 = pneg %p1552_p13 }
 0x22e   : > { %p1559_p6 = por %p1558_p4, %p1557_p3 }
 0x230   : > { %p1560_p7 = pnand %p1559_p6, %p1553_p0 }
 0x232   : > { %1563 = shalt.err (!%p1560_p7)
}
 0x233   : > { %1432 = dma.vmem_to_hbm [thread:$0]  (%p1715_p5), %s1237_s25, 128, %s2236_s24, %s1220_s28  }
 0x234 PF: > { %p1438_p8 = scmp.ge.s32.totalorder %s1620_s14, 2  ;;  %s1248_s8 = sand.u32 1, %s1600_s10  }
 0x235   : > { %s1249_s9 = scalar_lea.sflag [#allocation8], %s1248_s8 }
 0x236   : > { %p1435_p10 = pnand %p1438_p8, %p1722_p9 }
 0x238   : > { %1595 = dma.done.wait (!%p1435_p10), %s1249_s9, 128  }
 0x239   : > { %1597 = vsyncadd (!%p1435_p10), %s1249_s9, 4294967168  ;;  %s33_s14 = sadd.s32 1, %s1620_s14   ;;  %s2376_s10 = smov %s1604_s11 }
 0x23a   : > { %p30_p11 = scmp.ge.s32.totalorder %s33_s14, 4   ;;  %s2377_s11 = smov %s1608_s2 }
 0x23b   : > { %s2378_s2 = smov %s1728_s22  ;;  %s2379_s12 = smov %s1616_s13 }
 0x23c   : > { %s2380_s13 = smov %s2382_s17  ;;  %32 = sbr.rel (!%p30_p11) target bundleno = 39 (0x27), region = 101 }
 0x243   :  { %1254 = vsyncpa [#allocation8], 1 }
 0x244   :  { %1256 = vsyncpa [#allocation8 + $0x1], 1 }

</bundles_post_ra>
